<compile_context>
chip_gen: v6e
topology: v6e:2x2x1
jax: 0.10.0
libtpu: 0.0.40
codegen_flags: <defaults>
</compile_context>

<pallas_src>
import functools
import math

import jax
import jax.numpy as jnp
from jax.experimental import pallas as pl
from jax.experimental.pallas import tpu as pltpu


def _round_up(x: int, m: int) -> int:
    return ((x + m - 1) // m) * m


def ffn_kernel(x_ref, g_ref, w13_ref, b13_ref, w2_ref, b2_ref, o_ref, *, eps, scale):
    # x_ref block: (tm, H) rows of the flattened input; full H resident -> lane reduce.
    x = x_ref[...].astype(jnp.float32)                      # (tm, H), f32 elementwise path

    # --- RMSNorm, exactly matching the PyTorch module's forward ---
    #   x1   = x + eps
    #   norm = ||x1 + eps||_2 * sqrt(H) + eps
    #   xn   = x1 / norm * g
    x1 = x + eps
    x2 = x1 + eps
    sq = jnp.sum(x2 * x2, axis=-1, keepdims=True)           # single pass, (tm, 1)
    norm = jnp.sqrt(sq) * scale + eps
    inv = pl.reciprocal(norm, approx=False)                 # EUP reciprocal, one per row
    xn = (x1 * inv) * g_ref[...]                            # (tm, H) f32
    xn_b = xn.astype(jnp.bfloat16)                          # bf16 into the MXU

    # --- SwiGLU: fused gate/up matmul (tm,H)@(H,2I), f32 accumulate ---
    h13 = jnp.dot(xn_b, w13_ref[...], preferred_element_type=jnp.float32) + b13_ref[...]
    half = h13.shape[-1] // 2
    h1 = h13[:, :half]                                      # w1 path
    h3 = h13[:, half:]                                      # w3 path
    swish = h1 * jax.nn.sigmoid(h1)                         # SiLU (EUP sigmoid), f32
    h = (swish * h3).astype(jnp.bfloat16)
    # TODO(synk): activation_dropout / resid dropout are identity in eval mode (not applied).

    out = jnp.dot(h, w2_ref[...], preferred_element_type=jnp.float32) + b2_ref[...]
    o_ref[...] = out.astype(o_ref.dtype)


def _build_call(kernel, M, H, I, tm, grid, out_dtype, vmem_limit, cost, single_buffer):
    if single_buffer:
        def const_spec(shape):
            return pl.BlockSpec(shape, lambda i: (0, 0), pipeline_mode=pl.Buffered(1))
    else:
        def const_spec(shape):
            return pl.BlockSpec(shape, lambda i: (0, 0))

    return pl.pallas_call(
        kernel,
        out_shape=jax.ShapeDtypeStruct((M, H), out_dtype),
        grid=grid,
        in_specs=[
            pl.BlockSpec((tm, H), lambda i: (i, 0)),   # x rows (pipelined)
            const_spec((1, H)),                        # g         (resident)
            const_spec((H, 2 * I)),                    # w1||w3    (resident, bf16)
            const_spec((1, 2 * I)),                    # b1||b3    (resident)
            const_spec((I, H)),                        # w2        (resident, bf16)
            const_spec((1, H)),                        # b2        (resident)
        ],
        out_specs=pl.BlockSpec((tm, H), lambda i: (i, 0)),
        compiler_params=pltpu.CompilerParams(
            dimension_semantics=("parallel",),
            vmem_limit_bytes=vmem_limit,
        ),
        cost_estimate=cost,
    )


def feed_forward(x, g, w1, b1, w3, b3, w2, b2, *, eps=1e-6, block_rows=512):
    """x: [..., H]; g: [H]; w1/w3: [H, I]; b1/b3: [I]; w2: [I, H]; b2: [H]."""
    orig_shape = x.shape
    H = orig_shape[-1]
    I = w1.shape[-1]
    M = math.prod(orig_shape[:-1])

    x2d = x.reshape(M, H)

    # Row tile: sublane-aligned, big as allowed, but prefer >=2 grid steps so the
    # "parallel" axis can shard across v7x's two TensorCores.
    tm_full = _round_up(M, 8)
    tm = min(block_rows, tm_full)
    if tm == tm_full and tm >= 16 and tm % 16 == 0:
        tm //= 2
    grid = (pl.cdiv(M, tm),)

    # One-time dtype prep (no per-iteration casts inside the kernel).
    w13 = jnp.concatenate([w1, w3], axis=1).astype(jnp.bfloat16)        # (H, 2I)
    b13 = jnp.concatenate([b1, b3]).reshape(1, 2 * I).astype(jnp.float32)
    w2b = w2.astype(jnp.bfloat16)                                       # (I, H)
    g2 = g.reshape(1, H).astype(jnp.float32)
    b2_2 = b2.reshape(1, H).astype(jnp.float32)
    scale = float(H) ** 0.5

    # Generation-aware VMEM budget: resident weights (single-buffered) + double-buffered
    # in/out row tiles + f32 intermediates, capped at ~75% of physical VMEM.
    resident = (2 * H * I + I * H) * 2 + (2 * I + 2 * H + H) * 4   # bf16 weights + f32 bias/g
    tiles = 4 * tm * H * 4                                         # x/out double buffers (f32)
    interm = tm * (4 * I + 4 * H) * 4                              # live f32/bf16 temporaries
    est = resident + tiles + interm
    try:
        cap = int(pltpu.get_tpu_info().vmem_capacity_bytes)
    except Exception:
        cap = 64 * 2**20
    vmem_limit = int(min(int(0.75 * cap), max(32 * 2**20, 2 * est)))

    cost = pl.CostEstimate(
        flops=int(6 * M * H * I + 10 * M * H + 6 * M * I),
        transcendentals=int(M * (2 * I + 1)),          # sigmoid ~ exp+recip per (M,I) elem + norm recip
        bytes_accessed=int(2 * M * H * 4 + 6 * H * I + (2 * I + 3 * H) * 4),
    )

    kernel = functools.partial(ffn_kernel, eps=eps, scale=scale)
    args = (x2d, g2, w13, b13, w2b, b2_2)

    try:
        out2d = _build_call(kernel, M, H, I, tm, grid, x.dtype, vmem_limit, cost,
                            single_buffer=True)(*args)
    except Exception:
        # Older Pallas without pipeline_mode support on TPU: fall back to default buffering.
        out2d = _build_call(kernel, M, H, I, tm, grid, x.dtype, vmem_limit, cost,
                            single_buffer=False)(*args)

    return out2d.reshape(orig_shape)


def feed_forward_ref(x, g, w1, b1, w3, b3, w2, b2, eps=1e-6):
    """Pure-JAX reference mirroring the PyTorch module (eval mode)."""
    H = x.shape[-1]
    scale = H ** 0.5
    x1 = x + eps
    norm = jnp.sqrt(jnp.sum((x1 + eps) ** 2, axis=-1, keepdims=True)) * scale + eps
    xn = x1 / norm * g
    swish = jax.nn.silu(xn @ w1 + b1)
    gate = xn @ w3 + b3
    h = swish * gate
    return h @ w2 + b2


if __name__ == "__main__":
    # Small but lane-dense shapes: hidden and intermediate are multiples of 128.
    B, S, H, I = 2, 16, 128, 256
    eps = 1e-6

    key = jax.random.PRNGKey(0)
    k = jax.random.split(key, 8)

    x = jax.random.normal(k[0], (B, S, H), dtype=jnp.float32)
    # Module init: g = ones(H) + eps; perturb slightly so the affine path is exercised.
    g = jnp.ones((H,), jnp.float32) + eps + 0.05 * jax.random.normal(k[1], (H,), jnp.float32)
    w1 = 0.05 * jax.random.normal(k[2], (H, I), jnp.float32)
    b1 = 0.05 * jax.random.normal(k[3], (I,), jnp.float32)
    w3 = 0.05 * jax.random.normal(k[4], (H, I), jnp.float32)
    b3 = 0.05 * jax.random.normal(k[5], (I,), jnp.float32)
    w2 = 0.05 * jax.random.normal(k[6], (I, H), jnp.float32)
    b2 = 0.05 * jax.random.normal(k[7], (H,), jnp.float32)

    out = feed_forward(x, g, w1, b1, w3, b3, w2, b2, eps=eps)
    out = jax.block_until_ready(out)

    ref = feed_forward_ref(x, g, w1, b1, w3, b3, w2, b2, eps=eps)
    assert out.shape == (B, S, H)
    err = float(jnp.max(jnp.abs(out - ref)))
    # bf16 MXU operands vs f32 reference -> modest tolerance (outputs are O(0.05-0.5)).
    assert jnp.allclose(out, ref, atol=2e-2, rtol=2e-2), f"mismatch vs reference, max err {err}"

    print("KERNEL_OK")
</pallas_src>

<mosaic_0001>
module attributes {stable_mosaic.version = 11 : i64} {
  func.func @ffn_kernel(%arg0: i32, %arg1: memref<16x128xf32, #tpu.memory_space<vmem>>, %arg2: memref<1x128xf32, #tpu.memory_space<vmem>>, %arg3: memref<128x512xbf16, #tpu.memory_space<vmem>>, %arg4: memref<1x512xf32, #tpu.memory_space<vmem>>, %arg5: memref<256x128xbf16, #tpu.memory_space<vmem>>, %arg6: memref<1x128xf32, #tpu.memory_space<vmem>>, %arg7: memref<16x128xf32, #tpu.memory_space<vmem>>) attributes {dimension_semantics = [#tpu.dimension_semantics<parallel>], iteration_bounds = array<i64: 2>, scalar_prefetch = 0 : i64, scratch_operands = 0 : i64, tpu.core_type = #tpu.core_type<tc>, window_params = [{transform_indices = @transform_0, window_bounds = array<i64: 16, 128>}, {pipeline_mode = #tpu.pipeline_mode<synchronous>, transform_indices = @transform_1, window_bounds = array<i64: 1, 128>}, {pipeline_mode = #tpu.pipeline_mode<synchronous>, transform_indices = @transform_2, window_bounds = array<i64: 128, 512>}, {pipeline_mode = #tpu.pipeline_mode<synchronous>, transform_indices = @transform_3, window_bounds = array<i64: 1, 512>}, {pipeline_mode = #tpu.pipeline_mode<synchronous>, transform_indices = @transform_4, window_bounds = array<i64: 256, 128>}, {pipeline_mode = #tpu.pipeline_mode<synchronous>, transform_indices = @transform_5, window_bounds = array<i64: 1, 128>}, {transform_indices = @transform_6, window_bounds = array<i64: 16, 128>}]} {
    %c0 = arith.constant 0 : index
    %c0_0 = arith.constant 0 : index
    %0 = vector.load %arg1[%c0, %c0_0] : memref<16x128xf32, #tpu.memory_space<vmem>>, vector<16x128xf32>
    %cst = arith.constant 9.99999997E-7 : f32
    %1 = vector.broadcast %cst : f32 to vector<16x128xf32>
    %2 = arith.addf %0, %1 : vector<16x128xf32>
    %cst_1 = arith.constant 9.99999997E-7 : f32
    %3 = vector.broadcast %cst_1 : f32 to vector<16x128xf32>
    %4 = arith.addf %2, %3 : vector<16x128xf32>
    %5 = arith.mulf %4, %4 : vector<16x128xf32>
    %cst_2 = arith.constant dense<0.000000e+00> : vector<16xf32>
    %6 = vector.multi_reduction <add>, %5, %cst_2 [1] : vector<16x128xf32> to vector<16xf32>
    %7 = vector.shape_cast %6 : vector<16xf32> to vector<16x1xf32>
    %8 = math.sqrt %7 : vector<16x1xf32>
    %cst_3 = arith.constant 11.3137083 : f32
    %9 = vector.broadcast %cst_3 : f32 to vector<16x1xf32>
    %10 = arith.mulf %8, %9 : vector<16x1xf32>
    %cst_4 = arith.constant 9.99999997E-7 : f32
    %11 = vector.broadcast %cst_4 : f32 to vector<16x1xf32>
    %12 = arith.addf %10, %11 : vector<16x1xf32>
    %13 = tpu.reciprocal %12 : vector<16x1xf32> -> vector<16x1xf32>
    %14 = vector.broadcast %13 : vector<16x1xf32> to vector<16x128xf32>
    %15 = arith.mulf %2, %14 : vector<16x128xf32>
    %c0_5 = arith.constant 0 : index
    %c0_6 = arith.constant 0 : index
    %16 = vector.load %arg2[%c0_5, %c0_6] : memref<1x128xf32, #tpu.memory_space<vmem>>, vector<1x128xf32>
    %17 = vector.broadcast %16 : vector<1x128xf32> to vector<16x128xf32>
    %18 = arith.mulf %15, %17 : vector<16x128xf32>
    %19 = arith.truncf %18 : vector<16x128xf32> to vector<16x128xbf16>
    %c0_7 = arith.constant 0 : index
    %c0_8 = arith.constant 0 : index
    %20 = vector.load %arg3[%c0_7, %c0_8] : memref<128x512xbf16, #tpu.memory_space<vmem>>, vector<128x512xbf16>
    %cst_9 = arith.constant dense<0.000000e+00> : vector<16x512xf32>
    %21 = tpu.matmul %19, %20, %cst_9 {dimension_numbers = #tpu.dot_dimension_numbers<[1], [0], [0], [1], [0, 0, 1, 1], [], []>} : vector<16x128xbf16>, vector<128x512xbf16>, vector<16x512xf32> -> vector<16x512xf32>
    %c0_10 = arith.constant 0 : index
    %c0_11 = arith.constant 0 : index
    %22 = vector.load %arg4[%c0_10, %c0_11] : memref<1x512xf32, #tpu.memory_space<vmem>>, vector<1x512xf32>
    %23 = vector.broadcast %22 : vector<1x512xf32> to vector<16x512xf32>
    %24 = arith.addf %21, %23 : vector<16x512xf32>
    %25 = vector.extract_strided_slice %24 {offsets = [0, 0], sizes = [16, 256], strides = [1, 1]} : vector<16x512xf32> to vector<16x256xf32>
    %26 = vector.extract_strided_slice %24 {offsets = [0, 256], sizes = [16, 256], strides = [1, 1]} : vector<16x512xf32> to vector<16x256xf32>
    %27 = arith.negf %25 : vector<16x256xf32>
    %28 = math.exp %27 : vector<16x256xf32>
    %cst_12 = arith.constant 1.000000e+00 : f32
    %29 = vector.broadcast %cst_12 : f32 to vector<16x256xf32>
    %30 = arith.addf %29, %28 : vector<16x256xf32>
    %31 = arith.divf %29, %30 : vector<16x256xf32>
    %32 = arith.mulf %25, %31 : vector<16x256xf32>
    %33 = arith.mulf %32, %26 : vector<16x256xf32>
    %34 = arith.truncf %33 : vector<16x256xf32> to vector<16x256xbf16>
    %c0_13 = arith.constant 0 : index
    %c0_14 = arith.constant 0 : index
    %35 = vector.load %arg5[%c0_13, %c0_14] : memref<256x128xbf16, #tpu.memory_space<vmem>>, vector<256x128xbf16>
    %cst_15 = arith.constant dense<0.000000e+00> : vector<16x128xf32>
    %36 = tpu.matmul %34, %35, %cst_15 {dimension_numbers = #tpu.dot_dimension_numbers<[1], [0], [0], [1], [0, 0, 1, 1], [], []>} : vector<16x256xbf16>, vector<256x128xbf16>, vector<16x128xf32> -> vector<16x128xf32>
    %c0_16 = arith.constant 0 : index
    %c0_17 = arith.constant 0 : index
    %37 = vector.load %arg6[%c0_16, %c0_17] : memref<1x128xf32, #tpu.memory_space<vmem>>, vector<1x128xf32>
    %38 = vector.broadcast %37 : vector<1x128xf32> to vector<16x128xf32>
    %39 = arith.addf %36, %38 : vector<16x128xf32>
    %c0_18 = arith.constant 0 : index
    %c0_19 = arith.constant 0 : index
    %40 = vector.load %arg7[%c0_18, %c0_19] : memref<16x128xf32, #tpu.memory_space<vmem>>, vector<16x128xf32>
    tpu.vector_store %arg7[%c0_18, %c0_19], %39 {strides = array<i32>} : memref<16x128xf32, #tpu.memory_space<vmem>>, vector<16x128xf32>,
    return
  }
  func.func @transform_0(%arg0: i32) -> (i32, i32) {
    %c0_i32 = arith.constant 0 : i32
    %c0_i32_0 = arith.constant 0 : i32
    return %arg0, %c0_i32 : i32, i32
  }
  func.func @transform_1(%arg0: i32) -> (i32, i32) {
    %c0_i32 = arith.constant 0 : i32
    %c0_i32_0 = arith.constant 0 : i32
    %c0_i32_1 = arith.constant 0 : i32
    return %c0_i32, %c0_i32_0 : i32, i32
  }
  func.func @transform_2(%arg0: i32) -> (i32, i32) {
    %c0_i32 = arith.constant 0 : i32
    %c0_i32_0 = arith.constant 0 : i32
    %c0_i32_1 = arith.constant 0 : i32
    return %c0_i32, %c0_i32_0 : i32, i32
  }
  func.func @transform_3(%arg0: i32) -> (i32, i32) {
    %c0_i32 = arith.constant 0 : i32
    %c0_i32_0 = arith.constant 0 : i32
    %c0_i32_1 = arith.constant 0 : i32
    return %c0_i32, %c0_i32_0 : i32, i32
  }
  func.func @transform_4(%arg0: i32) -> (i32, i32) {
    %c0_i32 = arith.constant 0 : i32
    %c0_i32_0 = arith.constant 0 : i32
    %c0_i32_1 = arith.constant 0 : i32
    return %c0_i32, %c0_i32_0 : i32, i32
  }
  func.func @transform_5(%arg0: i32) -> (i32, i32) {
    %c0_i32 = arith.constant 0 : i32
    %c0_i32_0 = arith.constant 0 : i32
    %c0_i32_1 = arith.constant 0 : i32
    return %c0_i32, %c0_i32_0 : i32, i32
  }
  func.func @transform_6(%arg0: i32) -> (i32, i32) {
    %c0_i32 = arith.constant 0 : i32
    %c0_i32_0 = arith.constant 0 : i32
    return %arg0, %c0_i32 : i32, i32
  }
}

module attributes {stable_mosaic.version = 11 : i64} {
  func.func @ffn_kernel(%arg0: i32, %arg1: memref<16x128xf32, #tpu.memory_space<vmem>>, %arg2: memref<1x128xf32, #tpu.memory_space<vmem>>, %arg3: memref<128x512xbf16, #tpu.memory_space<vmem>>, %arg4: memref<1x512xf32, #tpu.memory_space<vmem>>, %arg5: memref<256x128xbf16, #tpu.memory_space<vmem>>, %arg6: memref<1x128xf32, #tpu.memory_space<vmem>>, %arg7: memref<16x128xf32, #tpu.memory_space<vmem>>) attributes {dimension_semantics = [#tpu.dimension_semantics<parallel>], iteration_bounds = array<i64: 2>, scalar_prefetch = 0 : i64, scratch_operands = 0 : i64, tpu.core_type = #tpu.core_type<tc>, window_params = [{transform_indices = @transform_0, window_bounds = array<i64: 16, 128>}, {pipeline_mode = #tpu.pipeline_mode<synchronous>, transform_indices = @transform_1, window_bounds = array<i64: 1, 128>}, {pipeline_mode = #tpu.pipeline_mode<synchronous>, transform_indices = @transform_2, window_bounds = array<i64: 128, 512>}, {pipeline_mode = #tpu.pipeline_mode<synchronous>, transform_indices = @transform_3, window_bounds = array<i64: 1, 512>}, {pipeline_mode = #tpu.pipeline_mode<synchronous>, transform_indices = @transform_4, window_bounds = array<i64: 256, 128>}, {pipeline_mode = #tpu.pipeline_mode<synchronous>, transform_indices = @transform_5, window_bounds = array<i64: 1, 128>}, {transform_indices = @transform_6, window_bounds = array<i64: 16, 128>}]} {
    %c0 = arith.constant 0 : index
    %c0_0 = arith.constant 0 : index
    %0 = vector.load %arg1[%c0, %c0_0] : memref<16x128xf32, #tpu.memory_space<vmem>>, vector<16x128xf32>
    %cst = arith.constant 9.99999997E-7 : f32
    %1 = vector.broadcast %cst : f32 to vector<16x128xf32>
    %2 = arith.addf %0, %1 : vector<16x128xf32>
    %cst_1 = arith.constant 9.99999997E-7 : f32
    %3 = vector.broadcast %cst_1 : f32 to vector<16x128xf32>
    %4 = arith.addf %2, %3 : vector<16x128xf32>
    %5 = arith.mulf %4, %4 : vector<16x128xf32>
    %cst_2 = arith.constant dense<0.000000e+00> : vector<16xf32>
    %6 = vector.multi_reduction <add>, %5, %cst_2 [1] : vector<16x128xf32> to vector<16xf32>
    %7 = vector.shape_cast %6 : vector<16xf32> to vector<16x1xf32>
    %8 = math.sqrt %7 : vector<16x1xf32>
    %cst_3 = arith.constant 11.3137083 : f32
    %9 = vector.broadcast %cst_3 : f32 to vector<16x1xf32>
    %10 = arith.mulf %8, %9 : vector<16x1xf32>
    %cst_4 = arith.constant 9.99999997E-7 : f32
    %11 = vector.broadcast %cst_4 : f32 to vector<16x1xf32>
    %12 = arith.addf %10, %11 : vector<16x1xf32>
    %13 = tpu.reciprocal %12 : vector<16x1xf32> -> vector<16x1xf32>
    %14 = vector.broadcast %13 : vector<16x1xf32> to vector<16x128xf32>
    %15 = arith.mulf %2, %14 : vector<16x128xf32>
    %c0_5 = arith.constant 0 : index
    %c0_6 = arith.constant 0 : index
    %16 = vector.load %arg2[%c0_5, %c0_6] : memref<1x128xf32, #tpu.memory_space<vmem>>, vector<1x128xf32>
    %17 = vector.broadcast %16 : vector<1x128xf32> to vector<16x128xf32>
    %18 = arith.mulf %15, %17 : vector<16x128xf32>
    %19 = arith.truncf %18 : vector<16x128xf32> to vector<16x128xbf16>
    %c0_7 = arith.constant 0 : index
    %c0_8 = arith.constant 0 : index
    %20 = vector.load %arg3[%c0_7, %c0_8] : memref<128x512xbf16, #tpu.memory_space<vmem>>, vector<128x512xbf16>
    %cst_9 = arith.constant dense<0.000000e+00> : vector<16x512xf32>
    %21 = tpu.matmul %19, %20, %cst_9 {dimension_numbers = #tpu.dot_dimension_numbers<[1], [0], [0], [1], [0, 0, 1, 1], [], []>} : vector<16x128xbf16>, vector<128x512xbf16>, vector<16x512xf32> -> vector<16x512xf32>
    %c0_10 = arith.constant 0 : index
    %c0_11 = arith.constant 0 : index
    %22 = vector.load %arg4[%c0_10, %c0_11] : memref<1x512xf32, #tpu.memory_space<vmem>>, vector<1x512xf32>
    %23 = vector.broadcast %22 : vector<1x512xf32> to vector<16x512xf32>
    %24 = arith.addf %21, %23 : vector<16x512xf32>
    %25 = vector.extract_strided_slice %24 {offsets = [0, 0], sizes = [16, 256], strides = [1, 1]} : vector<16x512xf32> to vector<16x256xf32>
    %26 = vector.extract_strided_slice %24 {offsets = [0, 256], sizes = [16, 256], strides = [1, 1]} : vector<16x512xf32> to vector<16x256xf32>
    %27 = arith.negf %25 : vector<16x256xf32>
    %28 = math.exp %27 : vector<16x256xf32>
    %cst_12 = arith.constant 1.000000e+00 : f32
    %29 = vector.broadcast %cst_12 : f32 to vector<16x256xf32>
    %30 = arith.addf %29, %28 : vector<16x256xf32>
    %31 = arith.divf %29, %30 : vector<16x256xf32>
    %32 = arith.mulf %25, %31 : vector<16x256xf32>
    %33 = arith.mulf %32, %26 : vector<16x256xf32>
    %34 = arith.truncf %33 : vector<16x256xf32> to vector<16x256xbf16>
    %c0_13 = arith.constant 0 : index
    %c0_14 = arith.constant 0 : index
    %35 = vector.load %arg5[%c0_13, %c0_14] : memref<256x128xbf16, #tpu.memory_space<vmem>>, vector<256x128xbf16>
    %cst_15 = arith.constant dense<0.000000e+00> : vector<16x128xf32>
    %36 = tpu.matmul %34, %35, %cst_15 {dimension_numbers = #tpu.dot_dimension_numbers<[1], [0], [0], [1], [0, 0, 1, 1], [], []>} : vector<16x256xbf16>, vector<256x128xbf16>, vector<16x128xf32> -> vector<16x128xf32>
    %c0_16 = arith.constant 0 : index
    %c0_17 = arith.constant 0 : index
    %37 = vector.load %arg6[%c0_16, %c0_17] : memref<1x128xf32, #tpu.memory_space<vmem>>, vector<1x128xf32>
    %38 = vector.broadcast %37 : vector<1x128xf32> to vector<16x128xf32>
    %39 = arith.addf %36, %38 : vector<16x128xf32>
    %c0_18 = arith.constant 0 : index
    %c0_19 = arith.constant 0 : index
    %40 = vector.load %arg7[%c0_18, %c0_19] : memref<16x128xf32, #tpu.memory_space<vmem>>, vector<16x128xf32>
    tpu.vector_store %arg7[%c0_18, %c0_19], %39 {strides = array<i32>} : memref<16x128xf32, #tpu.memory_space<vmem>>, vector<16x128xf32>,
    return
  }
  func.func @transform_0(%arg0: i32) -> (i32, i32) {
    %c0_i32 = arith.constant 0 : i32
    %c0_i32_0 = arith.constant 0 : i32
    return %arg0, %c0_i32 : i32, i32
  }
  func.func @transform_1(%arg0: i32) -> (i32, i32) {
    %c0_i32 = arith.constant 0 : i32
    %c0_i32_0 = arith.constant 0 : i32
    %c0_i32_1 = arith.constant 0 : i32
    return %c0_i32, %c0_i32_0 : i32, i32
  }
  func.func @transform_2(%arg0: i32) -> (i32, i32) {
    %c0_i32 = arith.constant 0 : i32
    %c0_i32_0 = arith.constant 0 : i32
    %c0_i32_1 = arith.constant 0 : i32
    return %c0_i32, %c0_i32_0 : i32, i32
  }
  func.func @transform_3(%arg0: i32) -> (i32, i32) {
    %c0_i32 = arith.constant 0 : i32
    %c0_i32_0 = arith.constant 0 : i32
    %c0_i32_1 = arith.constant 0 : i32
    return %c0_i32, %c0_i32_0 : i32, i32
  }
  func.func @transform_4(%arg0: i32) -> (i32, i32) {
    %c0_i32 = arith.constant 0 : i32
    %c0_i32_0 = arith.constant 0 : i32
    %c0_i32_1 = arith.constant 0 : i32
    return %c0_i32, %c0_i32_0 : i32, i32
  }
  func.func @transform_5(%arg0: i32) -> (i32, i32) {
    %c0_i32 = arith.constant 0 : i32
    %c0_i32_0 = arith.constant 0 : i32
    %c0_i32_1 = arith.constant 0 : i32
    return %c0_i32, %c0_i32_0 : i32, i32
  }
  func.func @transform_6(%arg0: i32) -> (i32, i32) {
    %c0_i32 = arith.constant 0 : i32
    %c0_i32_0 = arith.constant 0 : i32
    return %arg0, %c0_i32 : i32, i32
  }
}

</mosaic_0001>

<bundles_post_ra>
// kernel: tpu_custom_call.1
= control target key start
LH: loop header
LB: loop body
LE: loop exit
PB: predicated region body
PF: predicated region fallthrough
CT: control target
= control target key end

     0   :  { %11 = vsyncpa [#allocation3], 0  ;;  %s1631_s0 = inlined_call_operand.hbm [shape: f32[32,128], index: 0, kind: input, shape index: {}]   ;;  %s1632_s1 = inlined_call_operand.vmem [shape: f32[1,128], index: 1, kind: input, shape index: {}]   ;;  %s1633_s2 = inlined_call_operand.hbm [shape: bf16[128,512], index: 2, kind: input, shape index: {}]   ;;  %s1634_s3 = inlined_call_operand.vmem [shape: f32[1,512], index: 3, kind: input, shape index: {}]   ;;  %s1635_s4 = inlined_call_operand.hbm [shape: bf16[256,128], index: 4, kind: input, shape index: {}]   ;;  %s1636_s5 = inlined_call_operand.vmem [shape: f32[1,128], index: 5, kind: input, shape index: {}]   ;;  %s1637_s6 = inlined_call_operand.hbm [shape: f32[32,128], index: 6, kind: output, shape index: {}]  }
   0x1   :  { %13 = vsyncpa [#allocation3 + $0x1], 0 }
   0x2   :  { %14 = vsyncpa [#allocation6], 0 }
   0x3   :  { %15 = vsyncpa [#allocation4], 0 }
   0x4   :  { %17 = vsyncpa [#allocation4 + $0x1], 0  ;;  %s1422_s21 = smov 0   ;;  %s1424_s22 = smov 0  }
   0x5   :  { %s1426_s23 = smov 0   ;;  %s1428_s24 = smov 0  }
   0x6 LB: > { %s1443_s25 = sadd.s32 4294967295, %s1372_s24   ;;  %s964_s26 = sadd.s32 4294967294, %s1372_s24   ;;  %s1372_s24 = sphi %s1428_s24, %s1659_s24   ;;  %s1368_s23 = sphi %s1426_s23, %s1658_s23   ;;  %s1364_s22 = sphi %s1424_s22, %s1657_s22   ;;  %s1360_s21 = sphi %s1422_s21, %s1656_s21  }
   0x7   : > { %p43_p0 = scmp.ne.s32.totalorder %s1364_s22, %s1360_s21  ;;  %p1638_p1 = scmp.eq.s32.totalorder %s1443_s25, 0 }
   0x8   : > { %p178_p3 = scmp.eq.s32.totalorder %s964_s26, 1  ;;  %p965_p5 = scmp.ge.s32.totalorder %s1372_s24, 1 }
   0x9   : > { %p1452_p4 = por %p1638_p1, %p43_p0  ;;  %p185_p7 = scmp.lt.s32.totalorder %s1372_s24, 3 }
   0xa   : > { %p1457_p6 = por %p178_p3, %p43_p0  ;;  %s1374_s30 = smov [#allocation5]  }
   0xb   : > { %s1642_s27 = scalar_select %p1452_p4, 1, 0 }
   0xc   : > { %s1643_s28 = scalar_select %p1457_p6, 1, 0 }
   0xd   : > { %p1462_p8 = pnand %p965_p5, %p185_p7  ;;  %s200_s7 = sshll.u32 %s1374_s30, 4  ;;  %s201_s7 = int_to_ptr.vmem [resolvable:$true] %s200_s7 }
   0xe   : > { %s1375_s9 = smov [#allocation7]   ;;  %s1235_s11 = scalar_lea.vmem %s201_s7, 4096 }
   0xf   : > { %s1644_s29 = scalar_select %p1462_p8, 1, 0 }
  0x10   : > { %p1072_p9 = pneg %p1462_p8  ;;  %s216_s10 = sshll.u32 %s1375_s9, 4  ;;  %s217_s10 = int_to_ptr.vmem [resolvable:$true] %s216_s10 }
  0x11   : > { %p1236_p13 = scmp.ne.s32.totalorder %s201_s7, %s1235_s11  ;;  %p1243_p5 = scmp.lt.s32.totalorder %s201_s7, %s201_s7 }
  0x12   : > { %p1471_p11 = pnand %p1072_p9, %p1638_p1  ;;  %p1244_p7 = scmp.lt.s32.totalorder %s1235_s11, %s1235_s11 }
  0x14   : > { %p1226_p12 = pneg %p1471_p11  ;;  %p1245_p10 = por %p1244_p7, %p1243_p5 }
  0x16   : > { %p1238_p0 = pnand %p1236_p13, %p1226_p12 }
  0x18   : > { %p1239_p3 = pneg %p1238_p0 }
  0x1a   : > { %p1246_p9 = pnand %p1245_p10, %p1239_p3 }
  0x1c   : > { %1249 = shalt.err (!%p1246_p9)
}
  0x1d   : > { %s1376_s12 = smov 256   ;;  %s1377_s13 = smov 16  }
  0x1e   : > { %1075 = dma.hbm_to_vmem [thread:$0]  (!%p1471_p11), %s1633_s2, 4096, %s201_s7, [#allocation6], %s1376_s12, %s1376_s12, %s1377_s13  }
  0x1f   : > { %s1261_s16 = scalar_lea.vmem %s217_s10, 2048  ;;  %p1269_p2 = scmp.lt.s32.totalorder %s217_s10, %s217_s10 }
  0x20   : > { %p1262_p1 = scmp.ne.s32.totalorder %s217_s10, %s1261_s16  ;;  %p1270_p6 = scmp.lt.s32.totalorder %s1261_s16, %s1261_s16 }
  0x22   : > { %p1264_p13 = pnand %p1262_p1, %p1226_p12  ;;  %p1271_p5 = por %p1270_p6, %p1269_p2 }
  0x24   : > { %p1265_p0 = pneg %p1264_p13 }
  0x26   : > { %p1272_p10 = pnand %p1271_p5, %p1265_p0 }
  0x28   : > { %1275 = shalt.err (!%p1272_p10)
}
  0x29   : > { %s1378_s17 = smov 64   ;;  %s1379_s18 = smov 4  }
  0x2a   : > { %1078 = dma.hbm_to_vmem [thread:$0]  (!%p1471_p11), %s1635_s4, 2048, %s217_s10, [#allocation6], %s1378_s17, %s1378_s17, %s1379_s18  }
  0x2b   : > { %s1494_s26 = sadd.s32 1, %s1372_s24   ;;  %s30_s7 = sadd.s32 1, %s1368_s23 }
  0x2c   : > { %s27_s30 = ssub.s32 %s1372_s24, %s1494_s26  ;;  %p37_p2 = scmp.ne.s32.totalorder %s1368_s23, %s1364_s22 }
  0x2d   : > { %p28_p1 = scmp.eq.s32.totalorder %s27_s30, 0  ;;  %p38_p6 = scmp.eq.s32.totalorder %s1372_s24, 0 }
  0x2e   : > { %p1646_p3 = scmp.eq.s32.totalorder %s1443_s25, 1  ;;  %p1089_p9 = scmp.lt.s32.totalorder %s1372_s24, 2 }
  0x2f   : > { %s1503_s9 = scalar_select %p28_p1, %s1368_s23, %s30_s7  }
  0x30   : > { %p39_p12 = por %p38_p6, %p37_p2  ;;  %p1507_p7 = por %p1646_p3, %p37_p2 }
  0x31   : > { %s233_s8 = sand.u32 1, %s1368_s23   ;;  %s1036_s10 = sshll.u32 %s1372_s24, 8 }
  0x32   : > { %s1647_s11 = scalar_select %p1507_p7, 1, 0 }
  0x33   : > { %s969_s12 = sshll.u32 %s233_s8, 4  ;;  %s1517_s15 = scalar_lea.hbm %s1631_s0, %s1036_s10 }
  0x34   : > { %s237_s16 = scalar_lea.vmem [#allocation2], %s969_s12  ;;  %p1521_p11 = pnand %p1089_p9, %p39_p12 }
  0x35   : > { %s244_s17 = sshll.u32 %s237_s16, 4  ;;  %s1525_s19 = scalar_lea.sflag [#allocation3], %s233_s8  ;;  %s1519_s17 = int_to_ptr.vmem [resolvable:$true] %s244_s17 }
  0x36   : > { %s1276_s20 = scalar_lea.hbm %s1517_s15, 256  ;;  %p1278_p0 = pneg %p1521_p11 }
  0x37   : > { %p1277_p13 = scmp.ne.s32.totalorder %s1517_s15, %s1276_s20  ;;  %s1281_s12 = scalar_lea.hbm %s1631_s0, 512 }
  0x38   : > { %p1282_p1 = scmp.lt.s32.totalorder %s1517_s15, %s1631_s0  ;;  %p1283_p2 = scmp.lt.s32.totalorder %s1281_s12, %s1276_s20 }
  0x39   : > { %p1279_p5 = pnand %p1278_p0, %p1277_p13 }
  0x3a   : > { %p1284_p6 = por %p1283_p2, %p1282_p1 }
  0x3b   : > { %p1280_p10 = pneg %p1279_p5 }
  0x3d   : > { %p1285_p12 = pnand %p1284_p6, %p1280_p10 }
  0x3f   : > { %1288 = shalt.err (!%p1285_p12)
}
  0x40   : > { %s1289_s8 = scalar_lea.vmem %s1519_s17, 256  ;;  %s1380_s14 = smov [#allocation2]  }
  0x41   : > { %p1290_p3 = scmp.ne.s32.totalorder %s1519_s17, %s1289_s8  ;;  %s1294_s16 = sshll.u32 %s1380_s14, 4  ;;  %s1295_s16 = int_to_ptr.vmem [resolvable:$false] %s1294_s16 }
  0x42   : > { %s1296_s30 = scalar_lea.vmem %s1295_s16, 512  ;;  %p1297_p5 = scmp.lt.s32.totalorder %s1519_s17, %s1295_s16 }
  0x43   : > { %p1292_p9 = pnand %p1290_p3, %p1278_p0  ;;  %p1298_p7 = scmp.lt.s32.totalorder %s1296_s30, %s1289_s8 }
  0x45   : > { %p1293_p13 = pneg %p1292_p9  ;;  %p1299_p4 = por %p1298_p7, %p1297_p5 }
  0x47   : > { %p1300_p8 = pnand %p1299_p4, %p1293_p13 }
  0x49   : > { %1303 = shalt.err (!%p1300_p8)
}
  0x4a   : > { %s1381_s20 = smov 128   ;;  %s1382_s7 = smov 8  }
  0x4b   : > { %1082 = dma.hbm_to_vmem [thread:$0]  (!%p1521_p11), %s1517_s15, 256, %s1519_s17, %s1525_s19, %s1381_s20, %s1381_s20, %s1382_s7  }
  0x4c   : > { %p1649_p0 = scmp.ne.s32.totalorder %s1644_s29, 0 }
  0x4d   : > { %s1549_s12 = sand.u32 (!%p1649_p0), 1, %s1364_s22   ;;  %p1650_p4 = scmp.ne.s32.totalorder (!%p1649_p0), %s1642_s27, 0 }
  0x4e   : > { %256 = sbr.rel (%p1649_p0) target bundleno = 735 (0x2df), region = 44  ;;  %s973_s10 = sshll.u32 (!%p1649_p0), %s1549_s12, 4 }
  0x4f   : > { %s259_s13 = scalar_lea.sflag (!%p1649_p0), [#allocation3], %s1549_s12  ;;  %s262_s8 = scalar_lea.vmem (!%p1649_p0), [#allocation2], %s973_s10 }
  0x53   : > { %1347 = dma.done.wait (%p1650_p4), %s259_s13, 256  }
  0x54   : > { %1349 = vsyncadd (%p1650_p4), %s259_s13, 4294967040  ;;  %p1651_p8 = scmp.eq.s32.totalorder %s1443_s25, 0 }
  0x56   : > { %1351 = dma.done.wait (%p1651_p8), [#allocation6], 6144   ;;  %p1652_p7 = pmov %p1651_p8 }
  0x57   : > { %v302_v0 = vld [vmem:[%s262_s8] sm:$0xff]  ;;  %v303_v1 = vld [vmem:[%s262_s8 + $0x8] sm:$0xff]  ;;  %v1383_v34 = vmov 0   ;;  %s298_s14 = scalar_lea.vmem [#allocation8], %s973_s10  ;;  %s1037_s30 = sshll.u32 %s1443_s25, 8 }
  0x58   : > { %1353 = vsyncadd (%p1652_p7), [#allocation6], 4294961152  ;;  %v1563_v2 = vadd.f32 1e-06, %v302_v0  ;;  %v1565_v3 = vadd.f32 1e-06, %v303_v1  ;;  %592 = vmatprep.mubr.bf16.mxu0 %v1383_v34  ;;  %635 = vmatprep.mubr.bf16.mxu1 %v1383_v34  ;;  %s1588_s13 = scalar_lea.hbm %s1637_s6, %s1037_s30 }
  0x59   : > { %v1136_v8 = vld [vmem:[#allocation5 + $0xe4] ss:$16 sps:$4 sm:$0xff]   ;;  %v1138_v9 = vld [vmem:[#allocation5 + $0xec] ss:$16 sps:$4 sm:$0xff]   ;;  %v1140_v10 = vld [vmem:[#allocation5 + $0xe0] ss:$16 sps:$4 sm:$0xff]  }
  0x5a   : > { %v306_v4 = vadd.f32 1e-06, %v1563_v2  ;;  %v307_v5 = vadd.f32 1e-06, %v1565_v3  ;;  %v1141_v11 = vld [vmem:[#allocation5 + $0xe8] ss:$16 sps:$4 sm:$0xff]   ;;  %560 = vmatprep.subr.bf16.mxu0 %v1136_v8  ;;  %603 = vmatprep.subr.bf16.mxu1 %v1138_v9 }
  0x5b   : > { %561 = vmatpush1.bf16.msra.mxu0 %v1140_v10  ;;  %604 = vmatpush1.bf16.msra.mxu1 %v1141_v11  ;;  %v1142_v12 = vld [vmem:[#allocation5 + $0xc4] ss:$16 sps:$4 sm:$0xff]   ;;  %v1144_v13 = vld [vmem:[#allocation5 + $0xcc] ss:$16 sps:$4 sm:$0xff]   ;;  %v1146_v14 = vld [vmem:[#allocation5 + $0xc0] ss:$16 sps:$4 sm:$0xff]  }
  0x5c   : > { %v308_v6 = vmul.f32 %v306_v4, %v306_v4  ;;  %v309_v7 = vmul.f32 %v307_v5, %v307_v5  ;;  %v1147_v15 = vld [vmem:[#allocation5 + $0xc8] ss:$16 sps:$4 sm:$0xff]   ;;  %562 = vmatprep.subr.bf16.mxu0 %v1142_v12  ;;  %605 = vmatprep.subr.bf16.mxu1 %v1144_v13  ;;  %v1148_v16 = vld [vmem:[#allocation5 + $0xa4] ss:$16 sps:$4 sm:$0xff]   ;;  %v1150_v17 = vld [vmem:[#allocation5 + $0xac] ss:$16 sps:$4 sm:$0xff]  }
  0x5d   : > { %v1152_v18 = vld [vmem:[#allocation5 + $0xa0] ss:$16 sps:$4 sm:$0xff]   ;;  %v1153_v19 = vld [vmem:[#allocation5 + $0xa8] ss:$16 sps:$4 sm:$0xff]   ;;  %v1154_v20 = vld [vmem:[#allocation5 + $0x84] ss:$16 sps:$4 sm:$0xff]  }
  0x5e   : > { %310 = vadd.xlane.f32.xlu0 %v308_v6  ;;  %v1156_v21 = vld [vmem:[#allocation5 + $0x8c] ss:$16 sps:$4 sm:$0xff]   ;;  %v1158_v22 = vld [vmem:[#allocation5 + $0x80] ss:$16 sps:$4 sm:$0xff]   ;;  %v1159_v23 = vld [vmem:[#allocation5 + $0x88] ss:$16 sps:$4 sm:$0xff]  }
  0x5f   : > { %563 = vmatpush1.bf16.msra.mxu0 %v1146_v14  ;;  %606 = vmatpush1.bf16.msra.mxu1 %v1147_v15  ;;  %v1160_v24 = vld [vmem:[#allocation5 + $0x64] ss:$16 sps:$4 sm:$0xff]   ;;  %v1162_v25 = vld [vmem:[#allocation5 + $0x6c] ss:$16 sps:$4 sm:$0xff]   ;;  %v1164_v26 = vld [vmem:[#allocation5 + $0x60] ss:$16 sps:$4 sm:$0xff]  }
  0x60   : > { %564 = vmatprep.subr.bf16.mxu0 %v1148_v16  ;;  %607 = vmatprep.subr.bf16.mxu1 %v1150_v17  ;;  %v1165_v27 = vld [vmem:[#allocation5 + $0x68] ss:$16 sps:$4 sm:$0xff]   ;;  %v1166_v28 = vld [vmem:[#allocation5 + $0x44] ss:$16 sps:$4 sm:$0xff]   ;;  %v1168_v29 = vld [vmem:[#allocation5 + $0x4c] ss:$16 sps:$4 sm:$0xff]   ;;  %v380_v17 = vlaneseq }
  0x61   : > { %v1170_v30 = vld [vmem:[#allocation5 + $0x40] ss:$16 sps:$4 sm:$0xff]   ;;  %v1171_v31 = vld [vmem:[#allocation5 + $0x48] ss:$16 sps:$4 sm:$0xff]   ;;  %v1172_v32 = vld [vmem:[#allocation5 + $0x24] ss:$16 sps:$4 sm:$0xff]  }
  0x62   : > { %312 = vadd.xlane.f32.xlu0 %v309_v7  ;;  %v1174_v33 = vld [vmem:[#allocation5 + $0x2c] ss:$16 sps:$4 sm:$0xff]   ;;  %v1176_v35 = vld [vmem:[#allocation5 + $0x20] ss:$16 sps:$4 sm:$0xff]   ;;  %v1177_v36 = vld [vmem:[#allocation5 + $0x28] ss:$16 sps:$4 sm:$0xff]  }
  0x63   : > { %565 = vmatpush1.bf16.msra.mxu0 %v1152_v18  ;;  %608 = vmatpush1.bf16.msra.mxu1 %v1153_v19  ;;  %v1178_v37 = vld [vmem:[#allocation5 + $0x4] ss:$16 sps:$4 sm:$0xff]   ;;  %v1180_v38 = vld [vmem:[#allocation5 + $0xc] ss:$16 sps:$4 sm:$0xff]   ;;  %v1182_v39 = vld [vmem:[#allocation5] ss:$16 sps:$4 sm:$0xff]  }
  0x64   : > { %566 = vmatprep.subr.bf16.mxu0 %v1154_v20  ;;  %609 = vmatprep.subr.bf16.mxu1 %v1156_v21  ;;  %v1183_v40 = vld [vmem:[#allocation5 + $0x8] ss:$16 sps:$4 sm:$0xff]   ;;  %v977_v60 = vld [vmem:[%s1632_s1] ss:$0 sm:$0xff]  ;;  %v1186_v5 = vld [vmem:[#allocation7 + $0x70] sm:$0xff]   ;;  %v381_v18 = vshrl.u32 %v380_v17, 7 }
  0x65   : > { %v1184_v1 = vld [vmem:[#allocation7 + $0x78] sm:$0xff]   ;;  %v1187_v6 = vld [vmem:[#allocation7 + $0x30] sm:$0xff]   ;;  %v1189_v7 = vld [vmem:[#allocation7 + $0x28] sm:$0xff]   ;;  %s872_s16 = sshll.u32 %s298_s14, 4  ;;  %s859_s10 = scalar_lea.sflag [#allocation4], %s1549_s12  ;;  %s1583_s16 = int_to_ptr.vmem [resolvable:$true] %s872_s16 }
  0x66   : > { %v1185_v4 = vld [vmem:[#allocation7 + $0x38] sm:$0xff]   ;;  %v1190_v8 = vld [vmem:[#allocation7 + $0x60] sm:$0xff]   ;;  %v1194_v11 = vld [vmem:[#allocation7 + $0x50] sm:$0xff]   ;;  %v382_v19 = vsub.s32 0, %v381_v18  ;;  %v386_v21 = vsub.s32 1, %v381_v18  ;;  %s1304_s8 = scalar_lea.vmem %s1583_s16, 256 }
  0x67   : > { %567 = vmatpush1.bf16.msra.mxu0 %v1158_v22  ;;  %610 = vmatpush1.bf16.msra.mxu1 %v1159_v23  ;;  %v1191_v9 = vld [vmem:[#allocation7 + $0x20] sm:$0xff]   ;;  %v1193_v10 = vld [vmem:[#allocation7 + $0x18] sm:$0xff]   ;;  %v1195_v12 = vld [vmem:[#allocation7 + $0x10] sm:$0xff]   ;;  %p1305_p11 = scmp.ne.s32.totalorder %s1583_s16, %s1304_s8  ;;  %p1653_p10 = scmp.ne.s32.totalorder %s1647_s11, 0 }
  0x68   : > { %568 = vmatprep.subr.bf16.mxu0 %v1160_v24  ;;  %611 = vmatprep.subr.bf16.mxu1 %v1162_v25  ;;  %v1196_v13 = vld [vmem:[#allocation7 + $0x48] sm:$0xff]   ;;  %v1198_v15 = vld [vmem:[#allocation7 + $0x40] sm:$0xff]   ;;  %s1384_s25 = smov [#allocation8]  }
  0x69   : > { %v1197_v14 = vld [vmem:[#allocation7 + $0x8] sm:$0xff]   ;;  %v1199_v16 = vld [vmem:[#allocation7] sm:$0xff]   ;;  %p1306_p1 = pnand %p1305_p11, %p1653_p10  ;;  %s1308_s27 = sshll.u32 %s1384_s25, 4  ;;  %s1309_s27 = int_to_ptr.vmem [resolvable:$false] %s1308_s27 }
  0x6a   : > { %v378_v20 = vld [vmem:[%s1634_s3] sm:$0xf]  ;;  %s1310_s29 = scalar_lea.vmem %s1309_s27, 512  ;;  %p1311_p6 = scmp.lt.s32.totalorder %s1583_s16, %s1309_s27 }
  0x6b   : > { %569 = vmatpush1.bf16.msra.mxu0 %v1164_v26  ;;  %612 = vmatpush1.bf16.msra.mxu1 %v1165_v27  ;;  %v383_v22 = vrot.slane %v378_v20, %v382_v19  ;;  %v387_v23 = vrot.slane %v378_v20, %v386_v21  ;;  %p1307_p2 = pneg %p1306_p1  ;;  %p1312_p12 = scmp.lt.s32.totalorder %s1310_s29, %s1304_s8 }
  0x6c   : > { %570 = vmatprep.subr.bf16.mxu0 %v1166_v28  ;;  %613 = vmatprep.subr.bf16.mxu1 %v1168_v29 }
  0x6d   : > { %p1313_p3 = por %p1312_p12, %p1311_p6 }
  0x6f   : > { %571 = vmatpush1.bf16.msra.mxu0 %v1170_v30  ;;  %614 = vmatpush1.bf16.msra.mxu1 %v1171_v31  ;;  %p1314_p9 = pnand %p1313_p3, %p1307_p2 }
  0x70   : > { %572 = vmatprep.subr.bf16.mxu0 %v1172_v32  ;;  %615 = vmatprep.subr.bf16.mxu1 %v1174_v33 }
  0x73   : > { %573 = vmatpush1.bf16.msra.mxu0 %v1176_v35  ;;  %616 = vmatpush1.bf16.msra.mxu1 %v1177_v36 }
  0x74   : > { %574 = vmatprep.subr.bf16.mxu0 %v1178_v37  ;;  %617 = vmatprep.subr.bf16.mxu1 %v1180_v38 }
  0x77   : > { %575 = vmatpush1.bf16.msra.mxu0 %v1182_v39  ;;  %618 = vmatpush1.bf16.msra.mxu1 %v1183_v40 }
  0x78   : > { %1038 = vmatprep.subr.bf16.mxu0 %v1184_v1 }
  0xe7   : > { %v311_v41 = vpop.xlane.xlu0 %310 }
  0xe8   : > { %1200 = vrsqrt.f32 %v311_v41  ;;  %vm316_vm0 = vcmp.eq.f32.partialorder %v311_v41, inf  ;;  %v319_v45 = vand.u32 2147483648, %v311_v41  ;;  %vm318_vm1 = vcmp.eq.f32.partialorder %v311_v41, 0.0 }
  0xeb   : > { %v313_v42 = vpop.xlane.xlu0 %312 }
  0xec   : > { %1202 = vrsqrt.f32 %v313_v42  ;;  %vm323_vm2 = vcmp.eq.f32.partialorder %v313_v42, inf  ;;  %v326_v51 = vand.u32 2147483648, %v313_v42  ;;  %vm325_vm3 = vcmp.eq.f32.partialorder %v313_v42, 0.0 }
  0xf5   : > { %v1201_v43 = vpop.eup %1200 }
  0xf6   : > { %v315_v44 = vmul.f32 %v1201_v43, %v311_v41 }
  0xf8   : > { %v317_v46 = vsel %vm316_vm0, %v311_v41, %v315_v44 }
  0xf9   : > { %v1203_v47 = vpop.eup %1202  ;;  %v320_v48 = vsel %vm318_vm1, %v319_v45, %v317_v46  ;;  %v394_v46 = vsub.s32 3, %v381_v18 }
  0xfa   : > { %v328_v49 = vmul.f32 11.313708, %v320_v48  ;;  %v322_v50 = vmul.f32 %v1203_v47, %v313_v42  ;;  %v390_v47 = vsub.s32 2, %v381_v18 }
  0xfc   : > { %v330_v52 = vadd.f32 1e-06, %v328_v49  ;;  %v324_v53 = vsel %vm323_vm2, %v313_v42, %v322_v50 }
  0xfd   : > { %v327_v54 = vsel %vm325_vm3, %v326_v51, %v324_v53  ;;  %v395_v51 = vrot.slane %v378_v20, %v394_v46  ;;  %v391_v53 = vrot.slane %v378_v20, %v390_v47 }
  0xfe   : > { %1204 = vrcp.f32 %v330_v52  ;;  %v329_v55 = vmul.f32 11.313708, %v327_v54 }
 0x100   : > { %v331_v56 = vadd.f32 1e-06, %v329_v55 }
 0x102   : > { %1206 = vrcp.f32 %v331_v56 }
 0x10b   : > { %v1205_v57 = vpop.eup %1204 }
 0x10c   : > { %v334_v58 = vmul.f32 %v1205_v57, %v1563_v2  ;;  %v1188_v2 = vld [vmem:[#allocation7 + $0x68] sm:$0xff]  }
 0x10e   : > { %v343_v62 = vmul.f32 %v977_v60, %v334_v58 }
 0x10f   : > { %v1207_v59 = vpop.eup %1206 }
 0x110   : > { %v335_v61 = vmul.f32 %v1207_v59, %v1565_v3  ;;  %v1192_v3 = vld [vmem:[#allocation7 + $0x58] sm:$0xff]  }
 0x112   : > { %v344_v63 = vmul.f32 %v977_v60, %v335_v61 }
 0x114   : > { %v345_v0 = vpack.c.bf16 %v344_v63, %v343_v62 }
 0x116   : > { %593 = vmatmul.mubr.bf16.vlgmr.msra.gmra.mxu0 %v345_v0  ;;  %636 = vmatmul.mubr.bf16.vlgmr.msra.gmra.mxu1 %v345_v0 }
 0x117   : > { %1039 = vmatpush3.bf16.msra.mxu0 %v1185_v4 }
 0x118   : > { %1040 = vmatprep.subr.bf16.mxu0 %v1186_v5 }
 0x11b   : > { %1041 = vmatpush3.bf16.msra.mxu0 %v1187_v6 }
 0x11c   : > { %1042 = vmatprep.subr.bf16.mxu0 %v1188_v2 }
 0x11f   : > { %1043 = vmatpush3.bf16.msra.mxu0 %v1189_v7 }
 0x120   : > { %1044 = vmatprep.subr.bf16.mxu0 %v1190_v8  ;;  %v1014_v8 = vld [vmem:[%s1636_s5] ss:$0 sm:$0xff] }
 0x123   : > { %1045 = vmatpush3.bf16.msra.mxu0 %v1191_v9 }
 0x124   : > { %1046 = vmatprep.subr.bf16.mxu0 %v1192_v3 }
 0x127   : > { %1047 = vmatpush3.bf16.msra.mxu0 %v1193_v10 }
 0x128   : > { %1048 = vmatprep.subr.bf16.mxu0 %v1194_v11 }
 0x12b   : > { %1049 = vmatpush3.bf16.msra.mxu0 %v1195_v12 }
 0x12c   : > { %1050 = vmatprep.subr.bf16.mxu0 %v1196_v13 }
 0x12f   : > { %1051 = vmatpush3.bf16.msra.mxu0 %v1197_v14 }
 0x130   : > { %1052 = vmatprep.subr.bf16.mxu0 %v1198_v15 }
 0x133   : > { %1053 = vmatpush3.bf16.msra.mxu0 %v1199_v16 }
 0x1d6   : > { %v594_v24 = vpop.f32.mrf.mxu0  ;;  %v637_v44 = vpop.f32.mrf.mxu1 }
 0x1d7   : > { %v595_v25 = vadd.f32 %v594_v24, %v383_v22  ;;  %v638_v63 = vadd.f32 %v637_v44, %v391_v53 }
 0x1d8   : > { %v596_v26 = vpop.f32.mrf.mxu0  ;;  %v639_v45 = vpop.f32.mrf.mxu1 }
 0x1d9   : > { %v1010_v27 = vmul.f32 -1.442695, %v595_v25  ;;  %v597_v28 = vadd.f32 %v596_v26, %v387_v23  ;;  %v640_v60 = vadd.f32 %v639_v45, %v395_v51 }
 0x1da   : > { %v598_v29 = vpop.f32.mrf.mxu0  ;;  %v641_v48 = vpop.f32.mrf.mxu1 }
 0x1db   : > { %1208 = vpow2.f32 %v1010_v27  ;;  %v1011_v30 = vmul.f32 -1.442695, %v597_v28  ;;  %v599_v31 = vadd.f32 %v598_v29, %v383_v22  ;;  %v642_v59 = vadd.f32 %v641_v48, %v391_v53 }
 0x1dc   : > { %v600_v32 = vpop.f32.mrf.mxu0  ;;  %v643_v54 = vpop.f32.mrf.mxu1 }
 0x1dd   : > { %1210 = vpow2.f32 %v1011_v30  ;;  %v1012_v33 = vmul.f32 -1.442695, %v599_v31  ;;  %v601_v34 = vadd.f32 %v600_v32, %v387_v23  ;;  %v644_v62 = vadd.f32 %v643_v54, %v395_v51 }
 0x1df   : > { %1212 = vpow2.f32 %v1012_v33  ;;  %v1013_v35 = vmul.f32 -1.442695, %v601_v34 }
 0x1e1   : > { %1214 = vpow2.f32 %v1013_v35 }
 0x1e8   : > { %v1209_v36 = vpop.eup %1208 }
 0x1e9   : > { %v658_v38 = vadd.f32 1.0, %v1209_v36 }
 0x1ea   : > { %v1211_v37 = vpop.eup %1210 }
 0x1eb   : > { %v659_v39 = vadd.f32 1.0, %v1211_v37 }
 0x1ec   : > { %v1213_v40 = vpop.eup %1212 }
 0x1ed   : > { %1216 = vrcp.f32 %v659_v39  ;;  %v660_v41 = vadd.f32 1.0, %v1213_v40 }
 0x1ee   : > { %v1215_v42 = vpop.eup %1214  ;;  %1218 = vrcp.f32 %v658_v38 }
 0x1ef   : > { %1220 = vrcp.f32 %v660_v41  ;;  %v661_v43 = vadd.f32 1.0, %v1215_v42 }
 0x1f1   : > { %1222 = vrcp.f32 %v661_v43 }
 0x1fa   : > { %v1217_v49 = vpop.eup %1216 }
 0x1fb   : > { %v1219_v50 = vpop.eup %1218  ;;  %v671_v55 = vmul.f32 %v1217_v49, %v597_v28 }
 0x1fc   : > { %v1221_v52 = vpop.eup %1220  ;;  %v670_v58 = vmul.f32 %v1219_v50, %v595_v25 }
 0x1fd   : > { %v672_v56 = vmul.f32 %v1221_v52, %v599_v31  ;;  %v675_v1 = vmul.f32 %v671_v55, %v640_v60 }
 0x1fe   : > { %v1223_v57 = vpop.eup %1222  ;;  %v674_v5 = vmul.f32 %v670_v58, %v638_v63 }
 0x1ff   : > { %v673_v61 = vmul.f32 %v1223_v57, %v601_v34  ;;  %v676_v0 = vmul.f32 %v672_v56, %v642_v59 }
 0x201   : > { %v677_v4 = vmul.f32 %v673_v61, %v644_v62  ;;  %v678_v2 = vpack.c.bf16 %v676_v0, %v674_v5 }
 0x203   : > { %v679_v6 = vpack.c.bf16 %v677_v4, %v675_v1 }
 0x205   : > { %847 = vmatprep.mubr.bf16.mxu0 %v679_v6 }
 0x206   : > { %848 = vmatmul.mubr.bf16.vlgmr.msra.gmra.mxu0 %v678_v2 }
 0x2c6   : > { %v1054_v7 = vpop.f32.mrf.mxu0 }
 0x2c8   : > { %v1055_v9 = vpop.f32.mrf.mxu0 }
 0x2c9   : > { %v1056_v3 = vadd.f32 %v1055_v9, %v1054_v7 }
 0x2ca   : > { %v1057_v10 = vpop.f32.mrf.mxu0 }
 0x2cb   : > { %v850_v11 = vadd.f32 %v1056_v3, %v1014_v8 }
 0x2cc   : > { %v1058_v12 = vpop.f32.mrf.mxu0 }
 0x2cd   : > { %856 = vst [vmem:[%s298_s14] sm:$0xff] %v850_v11  ;;  %v1059_v13 = vadd.f32 %v1058_v12, %v1057_v10 }
 0x2cf   : > { %v853_v14 = vadd.f32 %v1059_v13, %v1014_v8 }
 0x2d1   : > { %857 = vst [vmem:[%s298_s14 + $0x8] sm:$0xff] %v853_v14 }
 0x2d2   : > { %1317 = shalt.err (!%p1314_p9)
}
 0x2d3   : > { %s1318_s15 = scalar_lea.hbm %s1588_s13, 256  ;;  %s1322_s19 = scalar_lea.hbm %s1637_s6, 512 }
 0x2d4   : > { %p1319_p13 = scmp.ne.s32.totalorder %s1588_s13, %s1318_s15  ;;  %p1323_p4 = scmp.lt.s32.totalorder %s1588_s13, %s1637_s6 }
 0x2d5   : > { %p1324_p8 = scmp.lt.s32.totalorder %s1322_s19, %s1318_s15 }
 0x2d6   : > { %p1320_p5 = pnand %p1319_p13, %p1653_p10 }
 0x2d7   : > { %p1325_p7 = por %p1324_p8, %p1323_p4 }
 0x2d8   : > { %p1321_p0 = pneg %p1320_p5 }
 0x2da   : > { %p1326_p11 = pnand %p1325_p7, %p1321_p0 }
 0x2dc   : > { %1329 = shalt.err (!%p1326_p11)
}
 0x2dd   : > { %s1385_s20 = smov 128   ;;  %s1386_s7 = smov 8  }
 0x2de   : > { %1070 = dma.vmem_to_hbm [thread:$0]  (%p1653_p10), %s1583_s16, 256, %s1588_s13, %s859_s10, %s1385_s20, %s1385_s20, %s1386_s7  }
 0x2df PF: > { %s887_s8 = sand.u32 1, %s1360_s21   ;;  %p1654_p1 = scmp.ne.s32.totalorder %s1643_s28, 0 }
 0x2e0   : > { %p1655_p2 = scmp.ge.s32.totalorder %s1372_s24, 2  ;;  %s888_s25 = scalar_lea.sflag [#allocation4], %s887_s8 }
 0x2e2   : > { %p1084_p6 = pnand %p1655_p2, %p1654_p1 }
 0x2e4   : > { %p1085_p12 = pneg %p1084_p6 }
 0x2e6   : > { %1355 = dma.done.wait (%p1085_p12), %s888_s25, 256  }
 0x2e7   : > { %1357 = vsyncadd (%p1085_p12), %s888_s25, 4294967040  ;;  %p20_p3 = scmp.ge.s32.totalorder %s1494_s26, 4   ;;  %s1656_s21 = smov %s1364_s22 }
 0x2e8   : > { %s1657_s22 = smov %s1368_s23  ;;  %s1658_s23 = smov %s1503_s9 }
 0x2e9   : > { %s1659_s24 = smov %s1494_s26  ;;  %22 = sbr.rel (!%p20_p3) target bundleno = 6 (0x6), region = 97 }
 0x2ee   :  { %893 = vsyncpa [#allocation3], 1 }
 0x2ef   :  { %895 = vsyncpa [#allocation3 + $0x1], 1 }
 0x2f0   :  { %896 = vsyncpa [#allocation6], 1 }
 0x2f1   :  { %897 = vsyncpa [#allocation4], 1 }
 0x2f2   :  { %899 = vsyncpa [#allocation4 + $0x1], 1 }

// kernel: tpu_custom_call.1
= control target key start
LH: loop header
LB: loop body
LE: loop exit
PB: predicated region body
PF: predicated region fallthrough
CT: control target
= control target key end

     0   :  { %11 = vsyncpa [#allocation3], 0  ;;  %s1631_s0 = inlined_call_operand.hbm [shape: f32[32,128], index: 0, kind: input, shape index: {}]   ;;  %s1632_s1 = inlined_call_operand.vmem [shape: f32[1,128], index: 1, kind: input, shape index: {}]   ;;  %s1633_s2 = inlined_call_operand.hbm [shape: bf16[128,512], index: 2, kind: input, shape index: {}]   ;;  %s1634_s3 = inlined_call_operand.vmem [shape: f32[1,512], index: 3, kind: input, shape index: {}]   ;;  %s1635_s4 = inlined_call_operand.hbm [shape: bf16[256,128], index: 4, kind: input, shape index: {}]   ;;  %s1636_s5 = inlined_call_operand.vmem [shape: f32[1,128], index: 5, kind: input, shape index: {}]   ;;  %s1637_s6 = inlined_call_operand.hbm [shape: f32[32,128], index: 6, kind: output, shape index: {}]  }
   0x1   :  { %13 = vsyncpa [#allocation3 + $0x1], 0 }
   0x2   :  { %14 = vsyncpa [#allocation6], 0 }
   0x3   :  { %15 = vsyncpa [#allocation4], 0 }
   0x4   :  { %17 = vsyncpa [#allocation4 + $0x1], 0  ;;  %s1422_s21 = smov 0   ;;  %s1424_s22 = smov 0  }
   0x5   :  { %s1426_s23 = smov 0   ;;  %s1428_s24 = smov 0  }
   0x6 LB: > { %s1443_s25 = sadd.s32 4294967295, %s1372_s24   ;;  %s964_s26 = sadd.s32 4294967294, %s1372_s24   ;;  %s1372_s24 = sphi %s1428_s24, %s1659_s24   ;;  %s1368_s23 = sphi %s1426_s23, %s1658_s23   ;;  %s1364_s22 = sphi %s1424_s22, %s1657_s22   ;;  %s1360_s21 = sphi %s1422_s21, %s1656_s21  }
   0x7   : > { %p43_p0 = scmp.ne.s32.totalorder %s1364_s22, %s1360_s21  ;;  %p1638_p1 = scmp.eq.s32.totalorder %s1443_s25, 0 }
   0x8   : > { %p178_p3 = scmp.eq.s32.totalorder %s964_s26, 1  ;;  %p965_p5 = scmp.ge.s32.totalorder %s1372_s24, 1 }
   0x9   : > { %p1452_p4 = por %p1638_p1, %p43_p0  ;;  %p185_p7 = scmp.lt.s32.totalorder %s1372_s24, 3 }
   0xa   : > { %p1457_p6 = por %p178_p3, %p43_p0  ;;  %s1374_s30 = smov [#allocation5]  }
   0xb   : > { %s1642_s27 = scalar_select %p1452_p4, 1, 0 }
   0xc   : > { %s1643_s28 = scalar_select %p1457_p6, 1, 0 }
   0xd   : > { %p1462_p8 = pnand %p965_p5, %p185_p7  ;;  %s200_s7 = sshll.u32 %s1374_s30, 4  ;;  %s201_s7 = int_to_ptr.vmem [resolvable:$true] %s200_s7 }
   0xe   : > { %s1375_s9 = smov [#allocation7]   ;;  %s1235_s11 = scalar_lea.vmem %s201_s7, 4096 }
   0xf   : > { %s1644_s29 = scalar_select %p1462_p8, 1, 0 }
  0x10   : > { %p1072_p9 = pneg %p1462_p8  ;;  %s216_s10 = sshll.u32 %s1375_s9, 4  ;;  %s217_s10 = int_to_ptr.vmem [resolvable:$true] %s216_s10 }
  0x11   : > { %p1236_p13 = scmp.ne.s32.totalorder %s201_s7, %s1235_s11  ;;  %p1243_p5 = scmp.lt.s32.totalorder %s201_s7, %s201_s7 }
  0x12   : > { %p1471_p11 = pnand %p1072_p9, %p1638_p1  ;;  %p1244_p7 = scmp.lt.s32.totalorder %s1235_s11, %s1235_s11 }
  0x14   : > { %p1226_p12 = pneg %p1471_p11  ;;  %p1245_p10 = por %p1244_p7, %p1243_p5 }
  0x16   : > { %p1238_p0 = pnand %p1236_p13, %p1226_p12 }
  0x18   : > { %p1239_p3 = pneg %p1238_p0 }
  0x1a   : > { %p1246_p9 = pnand %p1245_p10, %p1239_p3 }
  0x1c   : > { %1249 = shalt.err (!%p1246_p9)
}
  0x1d   : > { %s1376_s12 = smov 256   ;;  %s1377_s13 = smov 16  }
  0x1e   : > { %1075 = dma.hbm_to_vmem [thread:$0]  (!%p1471_p11), %s1633_s2, 4096, %s201_s7, [#allocation6], %s1376_s12, %s1376_s12, %s1377_s13  }
  0x1f   : > { %s1261_s16 = scalar_lea.vmem %s217_s10, 2048  ;;  %p1269_p2 = scmp.lt.s32.totalorder %s217_s10, %s217_s10 }
  0x20   : > { %p1262_p1 = scmp.ne.s32.totalorder %s217_s10, %s1261_s16  ;;  %p1270_p6 = scmp.lt.s32.totalorder %s1261_s16, %s1261_s16 }
  0x22   : > { %p1264_p13 = pnand %p1262_p1, %p1226_p12  ;;  %p1271_p5 = por %p1270_p6, %p1269_p2 }
  0x24   : > { %p1265_p0 = pneg %p1264_p13 }
  0x26   : > { %p1272_p10 = pnand %p1271_p5, %p1265_p0 }
  0x28   : > { %1275 = shalt.err (!%p1272_p10)
}
  0x29   : > { %s1378_s17 = smov 64   ;;  %s1379_s18 = smov 4  }
  0x2a   : > { %1078 = dma.hbm_to_vmem [thread:$0]  (!%p1471_p11), %s1635_s4, 2048, %s217_s10, [#allocation6], %s1378_s17, %s1378_s17, %s1379_s18  }
  0x2b   : > { %s1494_s26 = sadd.s32 1, %s1372_s24   ;;  %s30_s7 = sadd.s32 1, %s1368_s23 }
  0x2c   : > { %s27_s30 = ssub.s32 %s1372_s24, %s1494_s26  ;;  %p37_p2 = scmp.ne.s32.totalorder %s1368_s23, %s1364_s22 }
  0x2d   : > { %p28_p1 = scmp.eq.s32.totalorder %s27_s30, 0  ;;  %p38_p6 = scmp.eq.s32.totalorder %s1372_s24, 0 }
  0x2e   : > { %p1646_p3 = scmp.eq.s32.totalorder %s1443_s25, 1  ;;  %p1089_p9 = scmp.lt.s32.totalorder %s1372_s24, 2 }
  0x2f   : > { %s1503_s9 = scalar_select %p28_p1, %s1368_s23, %s30_s7  }
  0x30   : > { %p39_p12 = por %p38_p6, %p37_p2  ;;  %p1507_p7 = por %p1646_p3, %p37_p2 }
  0x31   : > { %s233_s8 = sand.u32 1, %s1368_s23   ;;  %s1036_s10 = sshll.u32 %s1372_s24, 8 }
  0x32   : > { %s1647_s11 = scalar_select %p1507_p7, 1, 0 }
  0x33   : > { %s969_s12 = sshll.u32 %s233_s8, 4  ;;  %s1517_s15 = scalar_lea.hbm %s1631_s0, %s1036_s10 }
  0x34   : > { %s237_s16 = scalar_lea.vmem [#allocation2], %s969_s12  ;;  %p1521_p11 = pnand %p1089_p9, %p39_p12 }
  0x35   : > { %s244_s17 = sshll.u32 %s237_s16, 4  ;;  %s1525_s19 = scalar_lea.sflag [#allocation3], %s233_s8  ;;  %s1519_s17 = int_to_ptr.vmem [resolvable:$true] %s244_s17 }
  0x36   : > { %s1276_s20 = scalar_lea.hbm %s1517_s15, 256  ;;  %p1278_p0 = pneg %p1521_p11 }
  0x37   : > { %p1277_p13 = scmp.ne.s32.totalorder %s1517_s15, %s1276_s20  ;;  %s1281_s12 = scalar_lea.hbm %s1631_s0, 512 }
  0x38   : > { %p1282_p1 = scmp.lt.s32.totalorder %s1517_s15, %s1631_s0  ;;  %p1283_p2 = scmp.lt.s32.totalorder %s1281_s12, %s1276_s20 }
  0x39   : > { %p1279_p5 = pnand %p1278_p0, %p1277_p13 }
  0x3a   : > { %p1284_p6 = por %p1283_p2, %p1282_p1 }
  0x3b   : > { %p1280_p10 = pneg %p1279_p5 }
  0x3d   : > { %p1285_p12 = pnand %p1284_p6, %p1280_p10 }
  0x3f   : > { %1288 = shalt.err (!%p1285_p12)
}
  0x40   : > { %s1289_s8 = scalar_lea.vmem %s1519_s17, 256  ;;  %s1380_s14 = smov [#allocation2]  }
  0x41   : > { %p1290_p3 = scmp.ne.s32.totalorder %s1519_s17, %s1289_s8  ;;  %s1294_s16 = sshll.u32 %s1380_s14, 4  ;;  %s1295_s16 = int_to_ptr.vmem [resolvable:$false] %s1294_s16 }
  0x42   : > { %s1296_s30 = scalar_lea.vmem %s1295_s16, 512  ;;  %p1297_p5 = scmp.lt.s32.totalorder %s1519_s17, %s1295_s16 }
  0x43   : > { %p1292_p9 = pnand %p1290_p3, %p1278_p0  ;;  %p1298_p7 = scmp.lt.s32.totalorder %s1296_s30, %s1289_s8 }
  0x45   : > { %p1293_p13 = pneg %p1292_p9  ;;  %p1299_p4 = por %p1298_p7, %p1297_p5 }
  0x47   : > { %p1300_p8 = pnand %p1299_p4, %p1293_p13 }
  0x49   : > { %1303 = shalt.err (!%p1300_p8)
}
  0x4a   : > { %s1381_s20 = smov 128   ;;  %s1382_s7 = smov 8  }
  0x4b   : > { %1082 = dma.hbm_to_vmem [thread:$0]  (!%p1521_p11), %s1517_s15, 256, %s1519_s17, %s1525_s19, %s1381_s20, %s1381_s20, %s1382_s7  }
  0x4c   : > { %p1649_p0 = scmp.ne.s32.totalorder %s1644_s29, 0 }
  0x4d   : > { %s1549_s12 = sand.u32 (!%p1649_p0), 1, %s1364_s22   ;;  %p1650_p4 = scmp.ne.s32.totalorder (!%p1649_p0), %s1642_s27, 0 }
  0x4e   : > { %256 = sbr.rel (%p1649_p0) target bundleno = 735 (0x2df), region = 44  ;;  %s973_s10 = sshll.u32 (!%p1649_p0), %s1549_s12, 4 }
  0x4f   : > { %s259_s13 = scalar_lea.sflag (!%p1649_p0), [#allocation3], %s1549_s12  ;;  %s262_s8 = scalar_lea.vmem (!%p1649_p0), [#allocation2], %s973_s10 }
  0x53   : > { %1347 = dma.done.wait (%p1650_p4), %s259_s13, 256  }
  0x54   : > { %1349 = vsyncadd (%p1650_p4), %s259_s13, 4294967040  ;;  %p1651_p8 = scmp.eq.s32.totalorder %s1443_s25, 0 }
  0x56   : > { %1351 = dma.done.wait (%p1651_p8), [#allocation6], 6144   ;;  %p1652_p7 = pmov %p1651_p8 }
  0x57   : > { %v302_v0 = vld [vmem:[%s262_s8] sm:$0xff]  ;;  %v303_v1 = vld [vmem:[%s262_s8 + $0x8] sm:$0xff]  ;;  %v1383_v34 = vmov 0   ;;  %s298_s14 = scalar_lea.vmem [#allocation8], %s973_s10  ;;  %s1037_s30 = sshll.u32 %s1443_s25, 8 }
  0x58   : > { %1353 = vsyncadd (%p1652_p7), [#allocation6], 4294961152  ;;  %v1563_v2 = vadd.f32 1e-06, %v302_v0  ;;  %v1565_v3 = vadd.f32 1e-06, %v303_v1  ;;  %592 = vmatprep.mubr.bf16.mxu0 %v1383_v34  ;;  %635 = vmatprep.mubr.bf16.mxu1 %v1383_v34  ;;  %s1588_s13 = scalar_lea.hbm %s1637_s6, %s1037_s30 }
  0x59   : > { %v1136_v8 = vld [vmem:[#allocation5 + $0xe4] ss:$16 sps:$4 sm:$0xff]   ;;  %v1138_v9 = vld [vmem:[#allocation5 + $0xec] ss:$16 sps:$4 sm:$0xff]   ;;  %v1140_v10 = vld [vmem:[#allocation5 + $0xe0] ss:$16 sps:$4 sm:$0xff]  }
  0x5a   : > { %v306_v4 = vadd.f32 1e-06, %v1563_v2  ;;  %v307_v5 = vadd.f32 1e-06, %v1565_v3  ;;  %v1141_v11 = vld [vmem:[#allocation5 + $0xe8] ss:$16 sps:$4 sm:$0xff]   ;;  %560 = vmatprep.subr.bf16.mxu0 %v1136_v8  ;;  %603 = vmatprep.subr.bf16.mxu1 %v1138_v9 }
  0x5b   : > { %561 = vmatpush1.bf16.msra.mxu0 %v1140_v10  ;;  %604 = vmatpush1.bf16.msra.mxu1 %v1141_v11  ;;  %v1142_v12 = vld [vmem:[#allocation5 + $0xc4] ss:$16 sps:$4 sm:$0xff]   ;;  %v1144_v13 = vld [vmem:[#allocation5 + $0xcc] ss:$16 sps:$4 sm:$0xff]   ;;  %v1146_v14 = vld [vmem:[#allocation5 + $0xc0] ss:$16 sps:$4 sm:$0xff]  }
  0x5c   : > { %v308_v6 = vmul.f32 %v306_v4, %v306_v4  ;;  %v309_v7 = vmul.f32 %v307_v5, %v307_v5  ;;  %v1147_v15 = vld [vmem:[#allocation5 + $0xc8] ss:$16 sps:$4 sm:$0xff]   ;;  %562 = vmatprep.subr.bf16.mxu0 %v1142_v12  ;;  %605 = vmatprep.subr.bf16.mxu1 %v1144_v13  ;;  %v1148_v16 = vld [vmem:[#allocation5 + $0xa4] ss:$16 sps:$4 sm:$0xff]   ;;  %v1150_v17 = vld [vmem:[#allocation5 + $0xac] ss:$16 sps:$4 sm:$0xff]  }
  0x5d   : > { %v1152_v18 = vld [vmem:[#allocation5 + $0xa0] ss:$16 sps:$4 sm:$0xff]   ;;  %v1153_v19 = vld [vmem:[#allocation5 + $0xa8] ss:$16 sps:$4 sm:$0xff]   ;;  %v1154_v20 = vld [vmem:[#allocation5 + $0x84] ss:$16 sps:$4 sm:$0xff]  }
  0x5e   : > { %310 = vadd.xlane.f32.xlu0 %v308_v6  ;;  %v1156_v21 = vld [vmem:[#allocation5 + $0x8c] ss:$16 sps:$4 sm:$0xff]   ;;  %v1158_v22 = vld [vmem:[#allocation5 + $0x80] ss:$16 sps:$4 sm:$0xff]   ;;  %v1159_v23 = vld [vmem:[#allocation5 + $0x88] ss:$16 sps:$4 sm:$0xff]  }
  0x5f   : > { %563 = vmatpush1.bf16.msra.mxu0 %v1146_v14  ;;  %606 = vmatpush1.bf16.msra.mxu1 %v1147_v15  ;;  %v1160_v24 = vld [vmem:[#allocation5 + $0x64] ss:$16 sps:$4 sm:$0xff]   ;;  %v1162_v25 = vld [vmem:[#allocation5 + $0x6c] ss:$16 sps:$4 sm:$0xff]   ;;  %v1164_v26 = vld [vmem:[#allocation5 + $0x60] ss:$16 sps:$4 sm:$0xff]  }
  0x60   : > { %564 = vmatprep.subr.bf16.mxu0 %v1148_v16  ;;  %607 = vmatprep.subr.bf16.mxu1 %v1150_v17  ;;  %v1165_v27 = vld [vmem:[#allocation5 + $0x68] ss:$16 sps:$4 sm:$0xff]   ;;  %v1166_v28 = vld [vmem:[#allocation5 + $0x44] ss:$16 sps:$4 sm:$0xff]   ;;  %v1168_v29 = vld [vmem:[#allocation5 + $0x4c] ss:$16 sps:$4 sm:$0xff]   ;;  %v380_v17 = vlaneseq }
  0x61   : > { %v1170_v30 = vld [vmem:[#allocation5 + $0x40] ss:$16 sps:$4 sm:$0xff]   ;;  %v1171_v31 = vld [vmem:[#allocation5 + $0x48] ss:$16 sps:$4 sm:$0xff]   ;;  %v1172_v32 = vld [vmem:[#allocation5 + $0x24] ss:$16 sps:$4 sm:$0xff]  }
  0x62   : > { %312 = vadd.xlane.f32.xlu0 %v309_v7  ;;  %v1174_v33 = vld [vmem:[#allocation5 + $0x2c] ss:$16 sps:$4 sm:$0xff]   ;;  %v1176_v35 = vld [vmem:[#allocation5 + $0x20] ss:$16 sps:$4 sm:$0xff]   ;;  %v1177_v36 = vld [vmem:[#allocation5 + $0x28] ss:$16 sps:$4 sm:$0xff]  }
  0x63   : > { %565 = vmatpush1.bf16.msra.mxu0 %v1152_v18  ;;  %608 = vmatpush1.bf16.msra.mxu1 %v1153_v19  ;;  %v1178_v37 = vld [vmem:[#allocation5 + $0x4] ss:$16 sps:$4 sm:$0xff]   ;;  %v1180_v38 = vld [vmem:[#allocation5 + $0xc] ss:$16 sps:$4 sm:$0xff]   ;;  %v1182_v39 = vld [vmem:[#allocation5] ss:$16 sps:$4 sm:$0xff]  }
  0x64   : > { %566 = vmatprep.subr.bf16.mxu0 %v1154_v20  ;;  %609 = vmatprep.subr.bf16.mxu1 %v1156_v21  ;;  %v1183_v40 = vld [vmem:[#allocation5 + $0x8] ss:$16 sps:$4 sm:$0xff]   ;;  %v977_v60 = vld [vmem:[%s1632_s1] ss:$0 sm:$0xff]  ;;  %v1186_v5 = vld [vmem:[#allocation7 + $0x70] sm:$0xff]   ;;  %v381_v18 = vshrl.u32 %v380_v17, 7 }
  0x65   : > { %v1184_v1 = vld [vmem:[#allocation7 + $0x78] sm:$0xff]   ;;  %v1187_v6 = vld [vmem:[#allocation7 + $0x30] sm:$0xff]   ;;  %v1189_v7 = vld [vmem:[#allocation7 + $0x28] sm:$0xff]   ;;  %s872_s16 = sshll.u32 %s298_s14, 4  ;;  %s859_s10 = scalar_lea.sflag [#allocation4], %s1549_s12  ;;  %s1583_s16 = int_to_ptr.vmem [resolvable:$true] %s872_s16 }
  0x66   : > { %v1185_v4 = vld [vmem:[#allocation7 + $0x38] sm:$0xff]   ;;  %v1190_v8 = vld [vmem:[#allocation7 + $0x60] sm:$0xff]   ;;  %v1194_v11 = vld [vmem:[#allocation7 + $0x50] sm:$0xff]   ;;  %v382_v19 = vsub.s32 0, %v381_v18  ;;  %v386_v21 = vsub.s32 1, %v381_v18  ;;  %s1304_s8 = scalar_lea.vmem %s1583_s16, 256 }
  0x67   : > { %567 = vmatpush1.bf16.msra.mxu0 %v1158_v22  ;;  %610 = vmatpush1.bf16.msra.mxu1 %v1159_v23  ;;  %v1191_v9 = vld [vmem:[#allocation7 + $0x20] sm:$0xff]   ;;  %v1193_v10 = vld [vmem:[#allocation7 + $0x18] sm:$0xff]   ;;  %v1195_v12 = vld [vmem:[#allocation7 + $0x10] sm:$0xff]   ;;  %p1305_p11 = scmp.ne.s32.totalorder %s1583_s16, %s1304_s8  ;;  %p1653_p10 = scmp.ne.s32.totalorder %s1647_s11, 0 }
  0x68   : > { %568 = vmatprep.subr.bf16.mxu0 %v1160_v24  ;;  %611 = vmatprep.subr.bf16.mxu1 %v1162_v25  ;;  %v1196_v13 = vld [vmem:[#allocation7 + $0x48] sm:$0xff]   ;;  %v1198_v15 = vld [vmem:[#allocation7 + $0x40] sm:$0xff]   ;;  %s1384_s25 = smov [#allocation8]  }
  0x69   : > { %v1197_v14 = vld [vmem:[#allocation7 + $0x8] sm:$0xff]   ;;  %v1199_v16 = vld [vmem:[#allocation7] sm:$0xff]   ;;  %p1306_p1 = pnand %p1305_p11, %p1653_p10  ;;  %s1308_s27 = sshll.u32 %s1384_s25, 4  ;;  %s1309_s27 = int_to_ptr.vmem [resolvable:$false] %s1308_s27 }
  0x6a   : > { %v378_v20 = vld [vmem:[%s1634_s3] sm:$0xf]  ;;  %s1310_s29 = scalar_lea.vmem %s1309_s27, 512  ;;  %p1311_p6 = scmp.lt.s32.totalorder %s1583_s16, %s1309_s27 }
  0x6b   : > { %569 = vmatpush1.bf16.msra.mxu0 %v1164_v26  ;;  %612 = vmatpush1.bf16.msra.mxu1 %v1165_v27  ;;  %v383_v22 = vrot.slane %v378_v20, %v382_v19  ;;  %v387_v23 = vrot.slane %v378_v20, %v386_v21  ;;  %p1307_p2 = pneg %p1306_p1  ;;  %p1312_p12 = scmp.lt.s32.totalorder %s1310_s29, %s1304_s8 }
  0x6c   : > { %570 = vmatprep.subr.bf16.mxu0 %v1166_v28  ;;  %613 = vmatprep.subr.bf16.mxu1 %v1168_v29 }
  0x6d   : > { %p1313_p3 = por %p1312_p12, %p1311_p6 }
  0x6f   : > { %571 = vmatpush1.bf16.msra.mxu0 %v1170_v30  ;;  %614 = vmatpush1.bf16.msra.mxu1 %v1171_v31  ;;  %p1314_p9 = pnand %p1313_p3, %p1307_p2 }
  0x70   : > { %572 = vmatprep.subr.bf16.mxu0 %v1172_v32  ;;  %615 = vmatprep.subr.bf16.mxu1 %v1174_v33 }
  0x73   : > { %573 = vmatpush1.bf16.msra.mxu0 %v1176_v35  ;;  %616 = vmatpush1.bf16.msra.mxu1 %v1177_v36 }
  0x74   : > { %574 = vmatprep.subr.bf16.mxu0 %v1178_v37  ;;  %617 = vmatprep.subr.bf16.mxu1 %v1180_v38 }
  0x77   : > { %575 = vmatpush1.bf16.msra.mxu0 %v1182_v39  ;;  %618 = vmatpush1.bf16.msra.mxu1 %v1183_v40 }
  0x78   : > { %1038 = vmatprep.subr.bf16.mxu0 %v1184_v1 }
  0xe7   : > { %v311_v41 = vpop.xlane.xlu0 %310 }
  0xe8   : > { %1200 = vrsqrt.f32 %v311_v41  ;;  %vm316_vm0 = vcmp.eq.f32.partialorder %v311_v41, inf  ;;  %v319_v45 = vand.u32 2147483648, %v311_v41  ;;  %vm318_vm1 = vcmp.eq.f32.partialorder %v311_v41, 0.0 }
  0xeb   : > { %v313_v42 = vpop.xlane.xlu0 %312 }
  0xec   : > { %1202 = vrsqrt.f32 %v313_v42  ;;  %vm323_vm2 = vcmp.eq.f32.partialorder %v313_v42, inf  ;;  %v326_v51 = vand.u32 2147483648, %v313_v42  ;;  %vm325_vm3 = vcmp.eq.f32.partialorder %v313_v42, 0.0 }
  0xf5   : > { %v1201_v43 = vpop.eup %1200 }
  0xf6   : > { %v315_v44 = vmul.f32 %v1201_v43, %v311_v41 }
  0xf8   : > { %v317_v46 = vsel %vm316_vm0, %v311_v41, %v315_v44 }
  0xf9   : > { %v1203_v47 = vpop.eup %1202  ;;  %v320_v48 = vsel %vm318_vm1, %v319_v45, %v317_v46  ;;  %v394_v46 = vsub.s32 3, %v381_v18 }
  0xfa   : > { %v328_v49 = vmul.f32 11.313708, %v320_v48  ;;  %v322_v50 = vmul.f32 %v1203_v47, %v313_v42  ;;  %v390_v47 = vsub.s32 2, %v381_v18 }
  0xfc   : > { %v330_v52 = vadd.f32 1e-06, %v328_v49  ;;  %v324_v53 = vsel %vm323_vm2, %v313_v42, %v322_v50 }
  0xfd   : > { %v327_v54 = vsel %vm325_vm3, %v326_v51, %v324_v53  ;;  %v395_v51 = vrot.slane %v378_v20, %v394_v46  ;;  %v391_v53 = vrot.slane %v378_v20, %v390_v47 }
  0xfe   : > { %1204 = vrcp.f32 %v330_v52  ;;  %v329_v55 = vmul.f32 11.313708, %v327_v54 }
 0x100   : > { %v331_v56 = vadd.f32 1e-06, %v329_v55 }
 0x102   : > { %1206 = vrcp.f32 %v331_v56 }
 0x10b   : > { %v1205_v57 = vpop.eup %1204 }
 0x10c   : > { %v334_v58 = vmul.f32 %v1205_v57, %v1563_v2  ;;  %v1188_v2 = vld [vmem:[#allocation7 + $0x68] sm:$0xff]  }
 0x10e   : > { %v343_v62 = vmul.f32 %v977_v60, %v334_v58 }
 0x10f   : > { %v1207_v59 = vpop.eup %1206 }
 0x110   : > { %v335_v61 = vmul.f32 %v1207_v59, %v1565_v3  ;;  %v1192_v3 = vld [vmem:[#allocation7 + $0x58] sm:$0xff]  }
 0x112   : > { %v344_v63 = vmul.f32 %v977_v60, %v335_v61 }
 0x114   : > { %v345_v0 = vpack.c.bf16 %v344_v63, %v343_v62 }
 0x116   : > { %593 = vmatmul.mubr.bf16.vlgmr.msra.gmra.mxu0 %v345_v0  ;;  %636 = vmatmul.mubr.bf16.vlgmr.msra.gmra.mxu1 %v345_v0 }
 0x117   : > { %1039 = vmatpush3.bf16.msra.mxu0 %v1185_v4 }
 0x118   : > { %1040 = vmatprep.subr.bf16.mxu0 %v1186_v5 }
 0x11b   : > { %1041 = vmatpush3.bf16.msra.mxu0 %v1187_v6 }
 0x11c   : > { %1042 = vmatprep.subr.bf16.mxu0 %v1188_v2 }
 0x11f   : > { %1043 = vmatpush3.bf16.msra.mxu0 %v1189_v7 }
 0x120   : > { %1044 = vmatprep.subr.bf16.mxu0 %v1190_v8  ;;  %v1014_v8 = vld [vmem:[%s1636_s5] ss:$0 sm:$0xff] }
 0x123   : > { %1045 = vmatpush3.bf16.msra.mxu0 %v1191_v9 }
 0x124   : > { %1046 = vmatprep.subr.bf16.mxu0 %v1192_v3 }
 0x127   : > { %1047 = vmatpush3.bf16.msra.mxu0 %v1193_v10 }
 0x128   : > { %1048 = vmatprep.subr.bf16.mxu0 %v1194_v11 }
 0x12b   : > { %1049 = vmatpush3.bf16.msra.mxu0 %v1195_v12 }
 0x12c   : > { %1050 = vmatprep.subr.bf16.mxu0 %v1196_v13 }
 0x12f   : > { %1051 = vmatpush3.bf16.msra.mxu0 %v1197_v14 }
 0x130   : > { %1052 = vmatprep.subr.bf16.mxu0 %v1198_v15 }
 0x133   : > { %1053 = vmatpush3.bf16.msra.mxu0 %v1199_v16 }
 0x1d6   : > { %v594_v24 = vpop.f32.mrf.mxu0  ;;  %v637_v44 = vpop.f32.mrf.mxu1 }
 0x1d7   : > { %v595_v25 = vadd.f32 %v594_v24, %v383_v22  ;;  %v638_v63 = vadd.f32 %v637_v44, %v391_v53 }
 0x1d8   : > { %v596_v26 = vpop.f32.mrf.mxu0  ;;  %v639_v45 = vpop.f32.mrf.mxu1 }
 0x1d9   : > { %v1010_v27 = vmul.f32 -1.442695, %v595_v25  ;;  %v597_v28 = vadd.f32 %v596_v26, %v387_v23  ;;  %v640_v60 = vadd.f32 %v639_v45, %v395_v51 }
 0x1da   : > { %v598_v29 = vpop.f32.mrf.mxu0  ;;  %v641_v48 = vpop.f32.mrf.mxu1 }
 0x1db   : > { %1208 = vpow2.f32 %v1010_v27  ;;  %v1011_v30 = vmul.f32 -1.442695, %v597_v28  ;;  %v599_v31 = vadd.f32 %v598_v29, %v383_v22  ;;  %v642_v59 = vadd.f32 %v641_v48, %v391_v53 }
 0x1dc   : > { %v600_v32 = vpop.f32.mrf.mxu0  ;;  %v643_v54 = vpop.f32.mrf.mxu1 }
 0x1dd   : > { %1210 = vpow2.f32 %v1011_v30  ;;  %v1012_v33 = vmul.f32 -1.442695, %v599_v31  ;;  %v601_v34 = vadd.f32 %v600_v32, %v387_v23  ;;  %v644_v62 = vadd.f32 %v643_v54, %v395_v51 }
 0x1df   : > { %1212 = vpow2.f32 %v1012_v33  ;;  %v1013_v35 = vmul.f32 -1.442695, %v601_v34 }
 0x1e1   : > { %1214 = vpow2.f32 %v1013_v35 }
 0x1e8   : > { %v1209_v36 = vpop.eup %1208 }
 0x1e9   : > { %v658_v38 = vadd.f32 1.0, %v1209_v36 }
 0x1ea   : > { %v1211_v37 = vpop.eup %1210 }
 0x1eb   : > { %v659_v39 = vadd.f32 1.0, %v1211_v37 }
 0x1ec   : > { %v1213_v40 = vpop.eup %1212 }
 0x1ed   : > { %1216 = vrcp.f32 %v659_v39  ;;  %v660_v41 = vadd.f32 1.0, %v1213_v40 }
 0x1ee   : > { %v1215_v42 = vpop.eup %1214  ;;  %1218 = vrcp.f32 %v658_v38 }
 0x1ef   : > { %1220 = vrcp.f32 %v660_v41  ;;  %v661_v43 = vadd.f32 1.0, %v1215_v42 }
 0x1f1   : > { %1222 = vrcp.f32 %v661_v43 }
 0x1fa   : > { %v1217_v49 = vpop.eup %1216 }
 0x1fb   : > { %v1219_v50 = vpop.eup %1218  ;;  %v671_v55 = vmul.f32 %v1217_v49, %v597_v28 }
 0x1fc   : > { %v1221_v52 = vpop.eup %1220  ;;  %v670_v58 = vmul.f32 %v1219_v50, %v595_v25 }
 0x1fd   : > { %v672_v56 = vmul.f32 %v1221_v52, %v599_v31  ;;  %v675_v1 = vmul.f32 %v671_v55, %v640_v60 }
 0x1fe   : > { %v1223_v57 = vpop.eup %1222  ;;  %v674_v5 = vmul.f32 %v670_v58, %v638_v63 }
 0x1ff   : > { %v673_v61 = vmul.f32 %v1223_v57, %v601_v34  ;;  %v676_v0 = vmul.f32 %v672_v56, %v642_v59 }
 0x201   : > { %v677_v4 = vmul.f32 %v673_v61, %v644_v62  ;;  %v678_v2 = vpack.c.bf16 %v676_v0, %v674_v5 }
 0x203   : > { %v679_v6 = vpack.c.bf16 %v677_v4, %v675_v1 }
 0x205   : > { %847 = vmatprep.mubr.bf16.mxu0 %v679_v6 }
 0x206   : > { %848 = vmatmul.mubr.bf16.vlgmr.msra.gmra.mxu0 %v678_v2 }
 0x2c6   : > { %v1054_v7 = vpop.f32.mrf.mxu0 }
 0x2c8   : > { %v1055_v9 = vpop.f32.mrf.mxu0 }
 0x2c9   : > { %v1056_v3 = vadd.f32 %v1055_v9, %v1054_v7 }
 0x2ca   : > { %v1057_v10 = vpop.f32.mrf.mxu0 }
 0x2cb   : > { %v850_v11 = vadd.f32 %v1056_v3, %v1014_v8 }
 0x2cc   : > { %v1058_v12 = vpop.f32.mrf.mxu0 }
 0x2cd   : > { %856 = vst [vmem:[%s298_s14] sm:$0xff] %v850_v11  ;;  %v1059_v13 = vadd.f32 %v1058_v12, %v1057_v10 }
 0x2cf   : > { %v853_v14 = vadd.f32 %v1059_v13, %v1014_v8 }
 0x2d1   : > { %857 = vst [vmem:[%s298_s14 + $0x8] sm:$0xff] %v853_v14 }
 0x2d2   : > { %1317 = shalt.err (!%p1314_p9)
}
 0x2d3   : > { %s1318_s15 = scalar_lea.hbm %s1588_s13, 256  ;;  %s1322_s19 = scalar_lea.hbm %s1637_s6, 512 }
 0x2d4   : > { %p1319_p13 = scmp.ne.s32.totalorder %s1588_s13, %s1318_s15  ;;  %p1323_p4 = scmp.lt.s32.totalorder %s1588_s13, %s1637_s6 }
 0x2d5   : > { %p1324_p8 = scmp.lt.s32.totalorder %s1322_s19, %s1318_s15 }
 0x2d6   : > { %p1320_p5 = pnand %p1319_p13, %p1653_p10 }
 0x2d7   : > { %p1325_p7 = por %p1324_p8, %p1323_p4 }
 0x2d8   : > { %p1321_p0 = pneg %p1320_p5 }
 0x2da   : > { %p1326_p11 = pnand %p1325_p7, %p1321_p0 }
 0x2dc   : > { %1329 = shalt.err (!%p1326_p11)
}
 0x2dd   : > { %s1385_s20 = smov 128   ;;  %s1386_s7 = smov 8  }
 0x2de   : > { %1070 = dma.vmem_to_hbm [thread:$0]  (%p1653_p10), %s1583_s16, 256, %s1588_s13, %s859_s10, %s1385_s20, %s1385_s20, %s1386_s7  }
 0x2df PF: > { %s887_s8 = sand.u32 1, %s1360_s21   ;;  %p1654_p1 = scmp.ne.s32.totalorder %s1643_s28, 0 }
 0x2e0   : > { %p1655_p2 = scmp.ge.s32.totalorder %s1372_s24, 2  ;;  %s888_s25 = scalar_lea.sflag [#allocation4], %s887_s8 }
 0x2e2   : > { %p1084_p6 = pnand %p1655_p2, %p1654_p1 }
 0x2e4   : > { %p1085_p12 = pneg %p1084_p6 }
 0x2e6   : > { %1355 = dma.done.wait (%p1085_p12), %s888_s25, 256  }
 0x2e7   : > { %1357 = vsyncadd (%p1085_p12), %s888_s25, 4294967040  ;;  %p20_p3 = scmp.ge.s32.totalorder %s1494_s26, 4   ;;  %s1656_s21 = smov %s1364_s22 }
 0x2e8   : > { %s1657_s22 = smov %s1368_s23  ;;  %s1658_s23 = smov %s1503_s9 }
 0x2e9   : > { %s1659_s24 = smov %s1494_s26  ;;  %22 = sbr.rel (!%p20_p3) target bundleno = 6 (0x6), region = 97 }
 0x2ee   :  { %893 = vsyncpa [#allocation3], 1 }
 0x2ef   :  { %895 = vsyncpa [#allocation3 + $0x1], 1 }
 0x2f0   :  { %896 = vsyncpa [#allocation6], 1 }
 0x2f1   :  { %897 = vsyncpa [#allocation4], 1 }
 0x2f2   :  { %899 = vsyncpa [#allocation4 + $0x1], 1 }

</bundles_post_ra>
